<compile_context>
chip_gen: v7x
topology: tpu7x:2x2x1
jax: 0.10.0
libtpu: 0.0.40
codegen_flags: <defaults>
</compile_context>

<pallas_src>
import functools

import jax
import jax.numpy as jnp
from jax import lax
from jax.experimental import pallas as pl
from jax.experimental.pallas import tpu as pltpu

EPS = 1e-5
LANE = 128


def _round_up(v, m):
    return (v + m - 1) // m * m


def _bn_relu(h, gamma, beta, row_mask, inv_n):
    """BatchNorm1d (training-mode batch stats, biased variance) + ReLU.

    `row_mask` zeroes the padded (fake) node rows so the statistics are
    computed over the real N nodes only.
    """
    hm = h * row_mask
    mu = jnp.sum(hm, axis=0, keepdims=True) * inv_n
    d = (h - mu) * row_mask
    var = jnp.sum(d * d, axis=0, keepdims=True) * inv_n
    hn = (h - mu) * lax.rsqrt(var + EPS) * gamma + beta
    return jnp.maximum(hn, 0.0)


def gcn_kernel(a_ref, x_ref, w1_ref, w2_ref, par_ref, o_ref,
               rhs_ref, hpre_ref, *, n_real, tm, n_pad, h_pad):
    """Fused 2-layer GCN forward.

    grid = (2 phases, n_pad // tm row blocks), last axis innermost:
      phase 0 : H1_pre[rows i] = A_hat[rows i, :] @ (X @ W1) + b1
      phase 1 : (step 0) BN1 + ReLU over full H1_pre, rhs <- H1 @ W2
                H2_pre[rows i] = A_hat[rows i, :] @ rhs + b2
                (last step) BN2 + ReLU + Linear(H,1) + ReLU + Sigmoid -> out

    rhs_ref  : (n_pad, h_pad) bf16 scratch -- right operand of A_hat @ (.)
    hpre_ref : (n_pad, h_pad) f32  scratch -- pre-batchnorm hidden state
    Both scratches persist across the whole grid.
    """
    phase = pl.program_id(0)
    i = pl.program_id(1)
    nblk = pl.num_programs(1)

    inv_n = 1.0 / float(n_real)
    row_mask = (lax.broadcasted_iota(jnp.int32, (n_pad, 1), 0)
                < n_real).astype(jnp.float32)

    # --- phase 0 prologue: rhs <- X @ W1 (bf16 operands, f32 accumulation) ---
    @pl.when(jnp.logical_and(phase == 0, i == 0))
    def _():
        xw = jnp.dot(x_ref[...], w1_ref[...],
                     preferred_element_type=jnp.float32)
        rhs_ref[...] = xw.astype(jnp.bfloat16)

    # --- phase 1 prologue: BN1 + ReLU over full H1_pre, rhs <- H1 @ W2 -------
    @pl.when(jnp.logical_and(phase == 1, i == 0))
    def _():
        h1 = _bn_relu(hpre_ref[...], par_ref[1:2, :], par_ref[2:3, :],
                      row_mask, inv_n)
        # TODO(synk): training-mode dropout (Bernoulli mask + 1/(1-p)) omitted;
        #             forward here is eval-mode identity.
        hw = jnp.dot(h1.astype(jnp.bfloat16), w2_ref[...],
                     preferred_element_type=jnp.float32)
        rhs_ref[...] = hw.astype(jnp.bfloat16)

    # --- streamed row block: hpre[rows i] = A_hat[rows i, :] @ rhs + bias ----
    acc = jnp.dot(a_ref[...], rhs_ref[...],
                  preferred_element_type=jnp.float32)
    bias = jnp.where(phase == 0, par_ref[0:1, :], par_ref[3:4, :])
    row0 = pl.multiple_of(i * tm, tm)
    hpre_ref[pl.ds(row0, tm), :] = acc + bias

    # --- epilogue (last grid step): BN2 + ReLU + Linear + ReLU + Sigmoid -----
    @pl.when(jnp.logical_and(phase == 1, i == nblk - 1))
    def _():
        h2 = _bn_relu(hpre_ref[...], par_ref[4:5, :], par_ref[5:6, :],
                      row_mask, inv_n)
        # Linear(H, 1) as a VPU multiply + lane reduction (no 1-column matmul).
        z = jnp.sum(h2 * par_ref[6:7, :], axis=-1, keepdims=True)
        z = z + par_ref[7:8, 0:1]
        z = jnp.maximum(z, 0.0)                               # ReLU
        sig = pl.reciprocal(1.0 + jnp.exp(-z), approx=True)   # Sigmoid (EUP)
        # Lane-dense store: broadcast the valid column across all 128 lanes.
        o_ref[...] = jnp.broadcast_to(sig, (n_pad, h_pad))


@jax.jit
def my_gcn_forward(x, edge_index, params):
    """x: (N, C_in) float32, edge_index: (2, E) int32 -> (N, 1) float32."""
    n, c_in = x.shape
    h = params["w1"].shape[1]

    # ------- dense symmetric-normalized adjacency (PyG gcn_norm semantics) ---
    # adj[t, s] sums (possibly duplicated) edges s->t; self-loops are added
    # only for nodes that do not already have one (add_remaining_self_loops).
    adj = jnp.zeros((n, n), jnp.float32)
    adj = adj.at[edge_index[1], edge_index[0]].add(1.0)
    diag = jnp.diagonal(adj)
    adj = adj + jnp.diag(jnp.where(diag > 0.0, 0.0, 1.0))
    deg = jnp.sum(adj, axis=1)
    dinv = jnp.where(deg > 0, lax.rsqrt(deg), 0.0)
    a_hat = dinv[:, None] * adj * dinv[None, :]
    # TODO(synk): for very large graphs keep A sparse (CSR offsets via scalar
    #             prefetch + row gather) instead of the dense N^2 matrix.

    # ------------------------- lane / sublane padding ------------------------
    n_pad = _round_up(n, LANE)
    tm = LANE if n_pad <= 1024 else 512        # A row-tile height
    n_pad = _round_up(n_pad, tm)
    c_pad = _round_up(c_in, LANE)
    h_pad = _round_up(h, LANE)

    def pad2(a, r, c):
        return jnp.zeros((r, c), a.dtype).at[:a.shape[0], :a.shape[1]].set(a)

    a_hat_p = pad2(a_hat, n_pad, n_pad).astype(jnp.bfloat16)
    x_p = pad2(x.astype(jnp.float32), n_pad, c_pad).astype(jnp.bfloat16)
    w1_p = pad2(params["w1"], c_pad, h_pad).astype(jnp.bfloat16)
    w2_p = pad2(params["w2"], h_pad, h_pad).astype(jnp.bfloat16)

    # Pack the small (1,H)/(1,1) parameters into one (8, h_pad) f32 slab:
    # rows = [b1, g1, be1, b2, g2, be2, wl^T, bl].
    slab = jnp.zeros((8, h_pad), jnp.float32)
    slab = slab.at[0, :h].set(params["b1"].reshape(-1))
    slab = slab.at[1, :h].set(params["g1"].reshape(-1))
    slab = slab.at[2, :h].set(params["be1"].reshape(-1))
    slab = slab.at[3, :h].set(params["b2"].reshape(-1))
    slab = slab.at[4, :h].set(params["g2"].reshape(-1))
    slab = slab.at[5, :h].set(params["be2"].reshape(-1))
    slab = slab.at[6, :h].set(params["wl"].reshape(-1))
    slab = slab.at[7, 0].set(params["bl"].reshape(-1)[0])

    n_blocks = n_pad // tm

    # VMEM working set estimate, used to raise the scoped VMEM limit.
    vmem_bytes = (
        2 * tm * n_pad * 2              # A_hat row tile, double-buffered, bf16
        + n_pad * c_pad * 2             # x (resident, bf16)
        + (c_pad + h_pad) * h_pad * 2   # w1, w2 (bf16)
        + 8 * h_pad * 4                 # packed params
        + n_pad * h_pad * 4             # output block (f32)
        + n_pad * h_pad * 2             # rhs scratch (bf16)
        + n_pad * h_pad * 4             # hpre scratch (f32)
    )
    vmem_limit = min(int(vmem_bytes * 1.5) + (2 << 20), 128 * 1024 * 1024)

    kernel = functools.partial(gcn_kernel, n_real=n, tm=tm,
                               n_pad=n_pad, h_pad=h_pad)

    out = pl.pallas_call(
        kernel,
        out_shape=jax.ShapeDtypeStruct((n_pad, h_pad), jnp.float32),
        grid_spec=pltpu.PrefetchScalarGridSpec(
            num_scalar_prefetch=0,
            grid=(2, n_blocks),
            in_specs=[
                pl.BlockSpec((tm, n_pad), lambda p, i: (i, 0)),     # A row tile
                pl.BlockSpec((n_pad, c_pad), lambda p, i: (0, 0)),  # X (resident)
                pl.BlockSpec((c_pad, h_pad), lambda p, i: (0, 0)),  # W1
                pl.BlockSpec((h_pad, h_pad), lambda p, i: (0, 0)),  # W2
                pl.BlockSpec((8, h_pad), lambda p, i: (0, 0)),      # params slab
            ],
            out_specs=pl.BlockSpec((n_pad, h_pad), lambda p, i: (0, 0)),
            scratch_shapes=[
                pltpu.VMEM((n_pad, h_pad), jnp.bfloat16),   # rhs = (.) @ W
                pltpu.VMEM((n_pad, h_pad), jnp.float32),    # pre-BN hidden
            ],
        ),
        # Both axes carry sequential dependencies (phase ordering + shared
        # BN / rhs scratches), so they must stay "arbitrary" (not "parallel").
        compiler_params=pltpu.CompilerParams(
            dimension_semantics=("arbitrary", "arbitrary"),
            vmem_limit_bytes=vmem_limit,
        ),
    )(a_hat_p, x_p, w1_p, w2_p, slab)

    return out[:n, 0:1]


def init_params(key, in_channels, hidden_channels):
    k1, k2, k3 = jax.random.split(key, 3)

    def glorot(k, fan_in, fan_out):
        lim = jnp.sqrt(6.0 / (fan_in + fan_out))
        return jax.random.uniform(k, (fan_in, fan_out), jnp.float32, -lim, lim)

    return {
        # GCNConv1
        "w1": glorot(k1, in_channels, hidden_channels),
        "b1": jnp.zeros((1, hidden_channels), jnp.float32),
        # BatchNorm1 (reset: gamma=1, beta=0)
        "g1": jnp.ones((1, hidden_channels), jnp.float32),
        "be1": jnp.zeros((1, hidden_channels), jnp.float32),
        # GCNConv2
        "w2": glorot(k2, hidden_channels, hidden_channels),
        "b2": jnp.zeros((1, hidden_channels), jnp.float32),
        # BatchNorm2
        "g2": jnp.ones((1, hidden_channels), jnp.float32),
        "be2": jnp.zeros((1, hidden_channels), jnp.float32),
        # Linear(hidden, 1)
        "wl": glorot(k3, hidden_channels, 1),
        "bl": jnp.zeros((1, 1), jnp.float32),
    }


if __name__ == "__main__":
    key = jax.random.PRNGKey(0)
    k_x, k_e, k_p = jax.random.split(key, 3)

    num_nodes = 16
    in_channels = 4
    hidden_channels = 32
    num_edges = 40

    x = jax.random.normal(k_x, (num_nodes, in_channels), jnp.float32)
    edge_index = jax.random.randint(k_e, (2, num_edges), 0, num_nodes, jnp.int32)
    params = init_params(k_p, in_channels, hidden_channels)

    out = my_gcn_forward(x, edge_index, params)
    out = jax.block_until_ready(out)
    assert out.shape == (num_nodes, 1)
    assert bool(jnp.all(jnp.isfinite(out)))
    assert bool(jnp.all((out >= 0.0) & (out <= 1.0)))
    print("KERNEL_OK")
</pallas_src>

<mosaic_0001>
module attributes {stable_mosaic.version = 11 : i64} {
  func.func @gcn_kernel(%arg0: i32, %arg1: i32, %arg2: memref<128x128xbf16, #tpu.memory_space<vmem>>, %arg3: memref<128x128xbf16, #tpu.memory_space<vmem>>, %arg4: memref<128x128xbf16, #tpu.memory_space<vmem>>, %arg5: memref<128x128xbf16, #tpu.memory_space<vmem>>, %arg6: memref<8x128xf32, #tpu.memory_space<vmem>>, %arg7: memref<128x128xf32, #tpu.memory_space<vmem>>, %arg8: memref<128x128xbf16, #tpu.memory_space<vmem>>, %arg9: memref<128x128xf32, #tpu.memory_space<vmem>>) attributes {dimension_semantics = [#tpu.dimension_semantics<arbitrary>, #tpu.dimension_semantics<arbitrary>], iteration_bounds = array<i64: 2, 1>, scalar_prefetch = 0 : i64, scratch_operands = 2 : i64, tpu.core_type = #tpu.core_type<tc>, window_params = [{transform_indices = @transform_0, window_bounds = array<i64: 128, 128>}, {pipeline_mode = #tpu.pipeline_mode<synchronous>, transform_indices = @transform_1, window_bounds = array<i64: 128, 128>}, {pipeline_mode = #tpu.pipeline_mode<synchronous>, transform_indices = @transform_2, window_bounds = array<i64: 128, 128>}, {pipeline_mode = #tpu.pipeline_mode<synchronous>, transform_indices = @transform_3, window_bounds = array<i64: 128, 128>}, {pipeline_mode = #tpu.pipeline_mode<synchronous>, transform_indices = @transform_4, window_bounds = array<i64: 8, 128>}, {pipeline_mode = #tpu.pipeline_mode<synchronous>, transform_indices = @transform_5, window_bounds = array<i64: 128, 128>}]} {
    %0 = tpu.iota {dimensions = array<i32: 0>} : vector<128x1xi32>
    %c16_i32 = arith.constant 16 : i32
    %1 = vector.broadcast %c16_i32 : i32 to vector<128x1xi32>
    %2 = arith.cmpi slt, %0, %1 : vector<128x1xi32>
    %3 = arith.extui %2 : vector<128x1xi1> to vector<128x1xi32>
    %4 = arith.sitofp %3 : vector<128x1xi32> to vector<128x1xf32>
    %c0_i32 = arith.constant 0 : i32
    %5 = arith.cmpi eq, %arg0, %c0_i32 : i32
    %c0_i32_0 = arith.constant 0 : i32
    %6 = arith.cmpi eq, %arg1, %c0_i32_0 : i32
    %7 = arith.andi %5, %6 : i1
    %8 = arith.extui %7 : i1 to i32
    %c0_i32_1 = arith.constant 0 : i32
    %9 = arith.cmpi ne, %8, %c0_i32_1 : i32
    scf.if %9 {
      %c0_15 = arith.constant 0 : index
      %c0_16 = arith.constant 0 : index
      %33 = vector.load %arg3[%c0_15, %c0_16] : memref<128x128xbf16, #tpu.memory_space<vmem>>, vector<128x128xbf16>
      %c0_17 = arith.constant 0 : index
      %c0_18 = arith.constant 0 : index
      %34 = vector.load %arg4[%c0_17, %c0_18] : memref<128x128xbf16, #tpu.memory_space<vmem>>, vector<128x128xbf16>
      %cst_19 = arith.constant dense<0.000000e+00> : vector<128x128xf32>
      %35 = tpu.matmul %33, %34, %cst_19 {dimension_numbers = #tpu.dot_dimension_numbers<[1], [0], [0], [1], [0, 0, 1, 1], [], []>} : vector<128x128xbf16>, vector<128x128xbf16>, vector<128x128xf32> -> vector<128x128xf32>
      %36 = arith.truncf %35 : vector<128x128xf32> to vector<128x128xbf16>
      %c0_20 = arith.constant 0 : index
      %c0_21 = arith.constant 0 : index
      %37 = vector.load %arg8[%c0_20, %c0_21] : memref<128x128xbf16, #tpu.memory_space<vmem>>, vector<128x128xbf16>
      tpu.vector_store %arg8[%c0_20, %c0_21], %36 {strides = array<i32>} : memref<128x128xbf16, #tpu.memory_space<vmem>>, vector<128x128xbf16>,
    } else {
    }
    %c1_i32 = arith.constant 1 : i32
    %10 = arith.cmpi eq, %arg0, %c1_i32 : i32
    %c0_i32_2 = arith.constant 0 : i32
    %11 = arith.cmpi eq, %arg1, %c0_i32_2 : i32
    %12 = arith.andi %10, %11 : i1
    %13 = arith.extui %12 : i1 to i32
    %c0_i32_3 = arith.constant 0 : i32
    %14 = arith.cmpi ne, %13, %c0_i32_3 : i32
    scf.if %14 {
      %c0_15 = arith.constant 0 : index
      %c0_16 = arith.constant 0 : index
      %33 = vector.load %arg9[%c0_15, %c0_16] : memref<128x128xf32, #tpu.memory_space<vmem>>, vector<128x128xf32>
      %c1 = arith.constant 1 : index
      %c0_17 = arith.constant 0 : index
      %34 = vector.load %arg6[%c1, %c0_17] : memref<8x128xf32, #tpu.memory_space<vmem>>, vector<1x128xf32>
      %c2 = arith.constant 2 : index
      %c0_18 = arith.constant 0 : index
      %35 = vector.load %arg6[%c2, %c0_18] : memref<8x128xf32, #tpu.memory_space<vmem>>, vector<1x128xf32>
      %36 = vector.broadcast %4 : vector<128x1xf32> to vector<128x128xf32>
      %37 = arith.mulf %33, %36 : vector<128x128xf32>
      %cst_19 = arith.constant dense<0.000000e+00> : vector<128xf32>
      %38 = vector.multi_reduction <add>, %37, %cst_19 [0] : vector<128x128xf32> to vector<128xf32>
      %39 = vector.shape_cast %38 : vector<128xf32> to vector<1x128xf32>
      %cst_20 = arith.constant 6.250000e-02 : f32
      %40 = vector.broadcast %cst_20 : f32 to vector<1x128xf32>
      %41 = arith.mulf %39, %40 : vector<1x128xf32>
      %42 = vector.broadcast %41 : vector<1x128xf32> to vector<128x128xf32>
      %43 = arith.subf %33, %42 : vector<128x128xf32>
      %44 = vector.broadcast %4 : vector<128x1xf32> to vector<128x128xf32>
      %45 = arith.mulf %43, %44 : vector<128x128xf32>
      %46 = arith.mulf %45, %45 : vector<128x128xf32>
      %cst_21 = arith.constant dense<0.000000e+00> : vector<128xf32>
      %47 = vector.multi_reduction <add>, %46, %cst_21 [0] : vector<128x128xf32> to vector<128xf32>
      %48 = vector.shape_cast %47 : vector<128xf32> to vector<1x128xf32>
      %cst_22 = arith.constant 6.250000e-02 : f32
      %49 = vector.broadcast %cst_22 : f32 to vector<1x128xf32>
      %50 = arith.mulf %48, %49 : vector<1x128xf32>
      %51 = vector.broadcast %41 : vector<1x128xf32> to vector<128x128xf32>
      %52 = arith.subf %33, %51 : vector<128x128xf32>
      %cst_23 = arith.constant 9.99999974E-6 : f32
      %53 = vector.broadcast %cst_23 : f32 to vector<1x128xf32>
      %54 = arith.addf %50, %53 : vector<1x128xf32>
      %55 = math.rsqrt %54 : vector<1x128xf32>
      %56 = vector.broadcast %55 : vector<1x128xf32> to vector<128x128xf32>
      %57 = arith.mulf %52, %56 : vector<128x128xf32>
      %58 = vector.broadcast %34 : vector<1x128xf32> to vector<128x128xf32>
      %59 = arith.mulf %57, %58 : vector<128x128xf32>
      %60 = vector.broadcast %35 : vector<1x128xf32> to vector<128x128xf32>
      %61 = arith.addf %59, %60 : vector<128x128xf32>
      %cst_24 = arith.constant 0.000000e+00 : f32
      %62 = vector.broadcast %cst_24 : f32 to vector<128x128xf32>
      %63 = arith.maximumf %61, %62 : vector<128x128xf32>
      %64 = arith.truncf %63 : vector<128x128xf32> to vector<128x128xbf16>
      %c0_25 = arith.constant 0 : index
      %c0_26 = arith.constant 0 : index
      %65 = vector.load %arg5[%c0_25, %c0_26] : memref<128x128xbf16, #tpu.memory_space<vmem>>, vector<128x128xbf16>
      %cst_27 = arith.constant dense<0.000000e+00> : vector<128x128xf32>
      %66 = tpu.matmul %64, %65, %cst_27 {dimension_numbers = #tpu.dot_dimension_numbers<[1], [0], [0], [1], [0, 0, 1, 1], [], []>} : vector<128x128xbf16>, vector<128x128xbf16>, vector<128x128xf32> -> vector<128x128xf32>
      %67 = arith.truncf %66 : vector<128x128xf32> to vector<128x128xbf16>
      %c0_28 = arith.constant 0 : index
      %c0_29 = arith.constant 0 : index
      %68 = vector.load %arg8[%c0_28, %c0_29] : memref<128x128xbf16, #tpu.memory_space<vmem>>, vector<128x128xbf16>
      tpu.vector_store %arg8[%c0_28, %c0_29], %67 {strides = array<i32>} : memref<128x128xbf16, #tpu.memory_space<vmem>>, vector<128x128xbf16>,
    } else {
    }
    %c0 = arith.constant 0 : index
    %c0_4 = arith.constant 0 : index
    %15 = vector.load %arg2[%c0, %c0_4] : memref<128x128xbf16, #tpu.memory_space<vmem>>, vector<128x128xbf16>
    %c0_5 = arith.constant 0 : index
    %c0_6 = arith.constant 0 : index
    %16 = vector.load %arg8[%c0_5, %c0_6] : memref<128x128xbf16, #tpu.memory_space<vmem>>, vector<128x128xbf16>
    %cst = arith.constant dense<0.000000e+00> : vector<128x128xf32>
    %17 = tpu.matmul %15, %16, %cst {dimension_numbers = #tpu.dot_dimension_numbers<[1], [0], [0], [1], [0, 0, 1, 1], [], []>} : vector<128x128xbf16>, vector<128x128xbf16>, vector<128x128xf32> -> vector<128x128xf32>
    %c0_i32_7 = arith.constant 0 : i32
    %18 = arith.cmpi eq, %arg0, %c0_i32_7 : i32
    %c0_8 = arith.constant 0 : index
    %c0_9 = arith.constant 0 : index
    %19 = vector.load %arg6[%c0_8, %c0_9] : memref<8x128xf32, #tpu.memory_space<vmem>>, vector<1x128xf32>
    %c3 = arith.constant 3 : index
    %c0_10 = arith.constant 0 : index
    %20 = vector.load %arg6[%c3, %c0_10] : memref<8x128xf32, #tpu.memory_space<vmem>>, vector<1x128xf32>
    %21 = arith.select %18, %19, %20 : vector<1x128xf32>
    %c128_i32 = arith.constant 128 : i32
    %22 = arith.muli %arg1, %c128_i32 : i32
    %23 = tpu.assume_multiple %22, 128 : i32
    %24 = vector.broadcast %21 : vector<1x128xf32> to vector<128x128xf32>
    %25 = arith.addf %17, %24 : vector<128x128xf32>
    %26 = arith.index_cast %23 : i32 to index
    %c0_11 = arith.constant 0 : index
    %27 = vector.load %arg9[%26, %c0_11] : memref<128x128xf32, #tpu.memory_space<vmem>>, vector<128x128xf32>
    tpu.vector_store %arg9[%26, %c0_11], %25 {strides = array<i32>} : memref<128x128xf32, #tpu.memory_space<vmem>>, vector<128x128xf32>,
    %c1_i32_12 = arith.constant 1 : i32
    %28 = arith.cmpi eq, %arg0, %c1_i32_12 : i32
    %c0_i32_13 = arith.constant 0 : i32
    %29 = arith.cmpi eq, %arg1, %c0_i32_13 : i32
    %30 = arith.andi %28, %29 : i1
    %31 = arith.extui %30 : i1 to i32
    %c0_i32_14 = arith.constant 0 : i32
    %32 = arith.cmpi ne, %31, %c0_i32_14 : i32
    scf.if %32 {
      %c0_15 = arith.constant 0 : index
      %c0_16 = arith.constant 0 : index
      %33 = vector.load %arg9[%c0_15, %c0_16] : memref<128x128xf32, #tpu.memory_space<vmem>>, vector<128x128xf32>
      %c4 = arith.constant 4 : index
      %c0_17 = arith.constant 0 : index
      %34 = vector.load %arg6[%c4, %c0_17] : memref<8x128xf32, #tpu.memory_space<vmem>>, vector<1x128xf32>
      %c5 = arith.constant 5 : index
      %c0_18 = arith.constant 0 : index
      %35 = vector.load %arg6[%c5, %c0_18] : memref<8x128xf32, #tpu.memory_space<vmem>>, vector<1x128xf32>
      %36 = vector.broadcast %4 : vector<128x1xf32> to vector<128x128xf32>
      %37 = arith.mulf %33, %36 : vector<128x128xf32>
      %cst_19 = arith.constant dense<0.000000e+00> : vector<128xf32>
      %38 = vector.multi_reduction <add>, %37, %cst_19 [0] : vector<128x128xf32> to vector<128xf32>
      %39 = vector.shape_cast %38 : vector<128xf32> to vector<1x128xf32>
      %cst_20 = arith.constant 6.250000e-02 : f32
      %40 = vector.broadcast %cst_20 : f32 to vector<1x128xf32>
      %41 = arith.mulf %39, %40 : vector<1x128xf32>
      %42 = vector.broadcast %41 : vector<1x128xf32> to vector<128x128xf32>
      %43 = arith.subf %33, %42 : vector<128x128xf32>
      %44 = vector.broadcast %4 : vector<128x1xf32> to vector<128x128xf32>
      %45 = arith.mulf %43, %44 : vector<128x128xf32>
      %46 = arith.mulf %45, %45 : vector<128x128xf32>
      %cst_21 = arith.constant dense<0.000000e+00> : vector<128xf32>
      %47 = vector.multi_reduction <add>, %46, %cst_21 [0] : vector<128x128xf32> to vector<128xf32>
      %48 = vector.shape_cast %47 : vector<128xf32> to vector<1x128xf32>
      %cst_22 = arith.constant 6.250000e-02 : f32
      %49 = vector.broadcast %cst_22 : f32 to vector<1x128xf32>
      %50 = arith.mulf %48, %49 : vector<1x128xf32>
      %51 = vector.broadcast %41 : vector<1x128xf32> to vector<128x128xf32>
      %52 = arith.subf %33, %51 : vector<128x128xf32>
      %cst_23 = arith.constant 9.99999974E-6 : f32
      %53 = vector.broadcast %cst_23 : f32 to vector<1x128xf32>
      %54 = arith.addf %50, %53 : vector<1x128xf32>
      %55 = math.rsqrt %54 : vector<1x128xf32>
      %56 = vector.broadcast %55 : vector<1x128xf32> to vector<128x128xf32>
      %57 = arith.mulf %52, %56 : vector<128x128xf32>
      %58 = vector.broadcast %34 : vector<1x128xf32> to vector<128x128xf32>
      %59 = arith.mulf %57, %58 : vector<128x128xf32>
      %60 = vector.broadcast %35 : vector<1x128xf32> to vector<128x128xf32>
      %61 = arith.addf %59, %60 : vector<128x128xf32>
      %cst_24 = arith.constant 0.000000e+00 : f32
      %62 = vector.broadcast %cst_24 : f32 to vector<128x128xf32>
      %63 = arith.maximumf %61, %62 : vector<128x128xf32>
      %c6 = arith.constant 6 : index
      %c0_25 = arith.constant 0 : index
      %64 = vector.load %arg6[%c6, %c0_25] : memref<8x128xf32, #tpu.memory_space<vmem>>, vector<1x128xf32>
      %65 = vector.broadcast %64 : vector<1x128xf32> to vector<128x128xf32>
      %66 = arith.mulf %63, %65 : vector<128x128xf32>
      %cst_26 = arith.constant dense<0.000000e+00> : vector<128xf32>
      %67 = vector.multi_reduction <add>, %66, %cst_26 [1] : vector<128x128xf32> to vector<128xf32>
      %68 = vector.shape_cast %67 : vector<128xf32> to vector<128x1xf32>
      %c7 = arith.constant 7 : index
      %c0_27 = arith.constant 0 : index
      %69 = vector.load %arg6[%c7, %c0_27] : memref<8x128xf32, #tpu.memory_space<vmem>>, vector<1x1xf32>
      %70 = vector.broadcast %69 : vector<1x1xf32> to vector<128x1xf32>
      %71 = arith.addf %68, %70 : vector<128x1xf32>
      %cst_28 = arith.constant 0.000000e+00 : f32
      %72 = vector.broadcast %cst_28 : f32 to vector<128x1xf32>
      %73 = arith.maximumf %71, %72 : vector<128x1xf32>
      %cst_29 = arith.constant 0.000000e+00 : f32
      %74 = vector.broadcast %cst_29 : f32 to vector<128x1xf32>
      %75 = arith.subf %74, %73 : vector<128x1xf32>
      %76 = math.exp %75 : vector<128x1xf32>
      %cst_30 = arith.constant 1.000000e+00 : f32
      %77 = vector.broadcast %cst_30 : f32 to vector<128x1xf32>
      %78 = arith.addf %77, %76 : vector<128x1xf32>
      %79 = tpu.reciprocal %78 {approx = true} : vector<128x1xf32> -> vector<128x1xf32>
      %80 = vector.shape_cast %79 : vector<128x1xf32> to vector<128x1xf32>
      %81 = vector.broadcast %80 : vector<128x1xf32> to vector<128x128xf32>
      %c0_31 = arith.constant 0 : index
      %c0_32 = arith.constant 0 : index
      %82 = vector.load %arg7[%c0_31, %c0_32] : memref<128x128xf32, #tpu.memory_space<vmem>>, vector<128x128xf32>
      tpu.vector_store %arg7[%c0_31, %c0_32], %81 {strides = array<i32>} : memref<128x128xf32, #tpu.memory_space<vmem>>, vector<128x128xf32>,
    } else {
    }
    return
  }
  func.func @transform_0(%arg0: i32, %arg1: i32) -> (i32, i32) {
    %c0_i32 = arith.constant 0 : i32
    %c0_i32_0 = arith.constant 0 : i32
    return %arg1, %c0_i32 : i32, i32
  }
  func.func @transform_1(%arg0: i32, %arg1: i32) -> (i32, i32) {
    %c0_i32 = arith.constant 0 : i32
    %c0_i32_0 = arith.constant 0 : i32
    %c0_i32_1 = arith.constant 0 : i32
    return %c0_i32, %c0_i32_0 : i32, i32
  }
  func.func @transform_2(%arg0: i32, %arg1: i32) -> (i32, i32) {
    %c0_i32 = arith.constant 0 : i32
    %c0_i32_0 = arith.constant 0 : i32
    %c0_i32_1 = arith.constant 0 : i32
    return %c0_i32, %c0_i32_0 : i32, i32
  }
  func.func @transform_3(%arg0: i32, %arg1: i32) -> (i32, i32) {
    %c0_i32 = arith.constant 0 : i32
    %c0_i32_0 = arith.constant 0 : i32
    %c0_i32_1 = arith.constant 0 : i32
    return %c0_i32, %c0_i32_0 : i32, i32
  }
  func.func @transform_4(%arg0: i32, %arg1: i32) -> (i32, i32) {
    %c0_i32 = arith.constant 0 : i32
    %c0_i32_0 = arith.constant 0 : i32
    %c0_i32_1 = arith.constant 0 : i32
    return %c0_i32, %c0_i32_0 : i32, i32
  }
  func.func @transform_5(%arg0: i32, %arg1: i32) -> (i32, i32) {
    %c0_i32 = arith.constant 0 : i32
    %c0_i32_0 = arith.constant 0 : i32
    %c0_i32_1 = arith.constant 0 : i32
    return %c0_i32, %c0_i32_0 : i32, i32
  }
}

</mosaic_0001>

<bundles_post_ra>
// kernel: my_gcn_forward.1
= control target key start
LH: loop header
LB: loop body
LE: loop exit
PB: predicated region body
PF: predicated region fallthrough
CT: control target
= control target key end

     0   :  { %s2056_s18 = smov 0   ;;  %s2058_s19 = smov 0   ;;  %s2557_s0 = inlined_call_operand.vmem [shape: bf16[128,128], index: 0, kind: input, shape index: {}]   ;;  %s2558_s1 = inlined_call_operand.vmem [shape: bf16[128,128], index: 1, kind: input, shape index: {}]   ;;  %s2559_s2 = inlined_call_operand.vmem [shape: bf16[128,128], index: 2, kind: input, shape index: {}]   ;;  %s2560_s3 = inlined_call_operand.vmem [shape: bf16[128,128], index: 3, kind: input, shape index: {}]   ;;  %s2561_s4 = inlined_call_operand.vmem [shape: f32[8,128], index: 4, kind: input, shape index: {}]   ;;  %s2562_s5 = inlined_call_operand.vmem [shape: f32[128,128], index: 5, kind: output, shape index: {}]  }
   0x1   :  { %s2060_s20 = smov 0  }
   0x2 LB: > { %s27_s21 = sadd.s32 1, %s2019_s19  ;;  %p1637_p0 = scmp.ge.s32.totalorder %s2023_s20, 1  ;;  %s2023_s20 = sphi %s2060_s20, %s15_s20   ;;  %s2019_s19 = sphi %s2058_s19, %s2564_s19   ;;  %s2015_s18 = sphi %s2056_s18, %s2563_s18  }
   0x3   : > { %p29_p1 = scmp.ge.s32.totalorder %s27_s21, 2  ;;  %p195_p2 = scmp.lt.s32.totalorder %s2023_s20, 3 }
   0x5   : > { %s2566_s21 = smov (%p29_p1, %s27_s21), 0  ;;  %p196_p3 = pnand %p1637_p0, %p195_p2 }
   0x6   : > { %p290_p4 = scmp.eq.s32.totalorder (!%p196_p3), %s2015_s18, 0 }
   0x7   : > { %199 = sbr.rel (%p196_p3) target bundleno = 1346 (0x542), region = 40 }
   0xe   : > { %295 = sbr.rel (!%p290_p4) target bundleno = 273 (0x111), region = 44  ;;  %v1899_v0 = vld [vmem:[%s2559_s2] sm:$0xff] (%p290_p4)   ;;  %v1900_v1 = vld [vmem:[%s2559_s2 + $0x8] sm:$0xff] (%p290_p4)   ;;  %v1901_v2 = vld [vmem:[%s2559_s2 + $0x10] sm:$0xff] (%p290_p4)  }
   0xf   : > { %1730 = vmatprep.subr.bf16.mxu0 (%p290_p4), %v1899_v0  ;;  %1826 = vmatprep.subr.bf16.mxu1 (%p290_p4), %v1899_v0  ;;  %v1902_v3 = vld [vmem:[%s2559_s2 + $0x18] sm:$0xff] (%p290_p4)   ;;  %v1907_v4 = vld [vmem:[%s2558_s1] sm:$0xff] (%p290_p4)   ;;  %v1904_v7 = vld [vmem:[%s2559_s2 + $0x28] sm:$0xff] (%p290_p4)  }
  0x10   : > { %1731 = vmatpush3.bf16.msra.mxu0 (%p290_p4), %v1899_v0  ;;  %1834 = vmatpush3.bf16.msra.mxu1 (%p290_p4), %v1899_v0  ;;  %v1908_v5 = vld [vmem:[%s2558_s1 + $0x20] sm:$0xff] (%p290_p4)   ;;  %v1905_v8 = vld [vmem:[%s2559_s2 + $0x30] sm:$0xff] (%p290_p4)   ;;  %v1906_v9 = vld [vmem:[%s2559_s2 + $0x38] sm:$0xff] (%p290_p4)  }
  0x11   : > { %1732 = vmatprep.subr.bf16.mxu0 (%p290_p4), %v1900_v1  ;;  %1827 = vmatprep.subr.bf16.mxu1 (%p290_p4), %v1900_v1  ;;  %v1903_v6 = vld [vmem:[%s2559_s2 + $0x20] sm:$0xff] (%p290_p4)   ;;  %v1909_v10 = vld [vmem:[%s2558_s1 + $0x8] sm:$0xff] (%p290_p4)   ;;  %v1911_v12 = vld [vmem:[%s2558_s1 + $0x10] sm:$0xff] (%p290_p4)  }
  0x12   : > { %1746 = vmatprep.mubr.bf16.mxu0 (%p290_p4), %v1907_v4  ;;  %1754 = vmatprep.mubr.bf16.mxu1 (%p290_p4), %v1908_v5  ;;  %v1910_v11 = vld [vmem:[%s2558_s1 + $0x28] sm:$0xff] (%p290_p4)   ;;  %v1912_v13 = vld [vmem:[%s2558_s1 + $0x30] sm:$0xff] (%p290_p4)   ;;  %v1913_v14 = vld [vmem:[%s2558_s1 + $0x18] sm:$0xff] (%p290_p4)  }
  0x13   : > { %v1914_v15 = vld [vmem:[%s2558_s1 + $0x38] sm:$0xff] (%p290_p4)  }
  0x14   : > { %1733 = vmatpush3.bf16.msra.mxu0 (%p290_p4), %v1900_v1  ;;  %1835 = vmatpush3.bf16.msra.mxu1 (%p290_p4), %v1900_v1 }
  0x15   : > { %1734 = vmatprep.subr.bf16.mxu0 %v1901_v2  ;;  %1828 = vmatprep.subr.bf16.mxu1 %v1901_v2 }
  0x18   : > { %1735 = vmatpush3.bf16.msra.mxu0 %v1901_v2  ;;  %1836 = vmatpush3.bf16.msra.mxu1 %v1901_v2 }
  0x19   : > { %1736 = vmatprep.subr.bf16.mxu0 %v1902_v3  ;;  %1829 = vmatprep.subr.bf16.mxu1 %v1902_v3 }
  0x1c   : > { %1737 = vmatpush3.bf16.msra.mxu0 %v1902_v3  ;;  %1837 = vmatpush3.bf16.msra.mxu1 %v1902_v3 }
  0x1d   : > { %1738 = vmatprep.subr.bf16.mxu0 %v1903_v6  ;;  %1830 = vmatprep.subr.bf16.mxu1 %v1903_v6 }
  0x20   : > { %1739 = vmatpush3.bf16.msra.mxu0 %v1903_v6  ;;  %1838 = vmatpush3.bf16.msra.mxu1 %v1903_v6 }
  0x21   : > { %1740 = vmatprep.subr.bf16.mxu0 %v1904_v7  ;;  %1831 = vmatprep.subr.bf16.mxu1 %v1904_v7 }
  0x24   : > { %1741 = vmatpush3.bf16.msra.mxu0 %v1904_v7  ;;  %1839 = vmatpush3.bf16.msra.mxu1 %v1904_v7 }
  0x25   : > { %1742 = vmatprep.subr.bf16.mxu0 %v1905_v8  ;;  %1832 = vmatprep.subr.bf16.mxu1 %v1905_v8 }
  0x28   : > { %1743 = vmatpush3.bf16.msra.mxu0 %v1905_v8  ;;  %1840 = vmatpush3.bf16.msra.mxu1 %v1905_v8 }
  0x29   : > { %1744 = vmatprep.subr.bf16.mxu0 %v1906_v9  ;;  %1833 = vmatprep.subr.bf16.mxu1 %v1906_v9 }
  0x2c   : > { %1745 = vmatpush3.bf16.msra.mxu0 %v1906_v9  ;;  %1841 = vmatpush3.bf16.msra.mxu1 %v1906_v9 }
  0x2f   : > { %1747 = vmatmul.mubr.bf16.vlgmr.msra.gmra.mrb[0].mxu0 %v1909_v10  ;;  %1755 = vmatmul.mubr.bf16.vlgmr.msra.gmra.mrb[0].mxu1 %v1910_v11 }
  0x30   : > { %1750 = vmatprep.mubr.bf16.mxu0 %v1911_v12  ;;  %1758 = vmatprep.mubr.bf16.mxu1 %v1912_v13 }
  0x37   : > { %1751 = vmatmul.mubr.bf16.gmra.mrb[4].mxu0 %v1913_v14  ;;  %1759 = vmatmul.mubr.bf16.gmra.mrb[4].mxu1 %v1914_v15 }
 0x102   : > { %v1748_v16 = vpop.f32.mrb[0].mxu0  ;;  %v1756_v17 = vpop.f32.mrb[0].mxu1 }
 0x103   : > { %v458_v18 = vpop.f32.mrb[1].mxu0  ;;  %v490_v19 = vpop.f32.mrb[1].mxu1 }
 0x104   : > { %v1749_v20 = vpop.f32.mrb[2].mxu0  ;;  %v1757_v21 = vpop.f32.mrb[2].mxu1 }
 0x105   : > { %v522_v22 = vpack.c.bf16 %v1749_v20, %v1748_v16  ;;  %v526_v23 = vpack.c.bf16 %v1757_v21, %v1756_v17  ;;  %v461_v24 = vpop.f32.mrb[3].mxu0  ;;  %v493_v25 = vpop.f32.mrb[3].mxu1 }
 0x106   : > { %v521_v26 = vpack.c.bf16 %v461_v24, %v458_v18  ;;  %v525_v27 = vpack.c.bf16 %v493_v25, %v490_v19 }
 0x107   : > { %530 = vst [vmem:[#allocation2 + $0x8] sm:$0xff] %v522_v22  ;;  %534 = vst [vmem:[#allocation2 + $0x28] sm:$0xff] %v526_v23 }
 0x108   : > { %529 = vst [vmem:[#allocation2] sm:$0xff] %v521_v26  ;;  %533 = vst [vmem:[#allocation2 + $0x20] sm:$0xff] %v525_v27 }
 0x10a   : > { %v1752_v28 = vpop.f32.mrb[4].mxu0  ;;  %v1760_v29 = vpop.f32.mrb[4].mxu1 }
 0x10b   : > { %v474_v30 = vpop.f32.mrb[5].mxu0  ;;  %v506_v31 = vpop.f32.mrb[5].mxu1 }
 0x10c   : > { %v1753_v32 = vpop.f32.mrb[6].mxu0  ;;  %v1761_v33 = vpop.f32.mrb[6].mxu1 }
 0x10d   : > { %v524_v34 = vpack.c.bf16 %v1753_v32, %v1752_v28  ;;  %v528_v35 = vpack.c.bf16 %v1761_v33, %v1760_v29  ;;  %v477_v36 = vpop.f32.mrb[7].mxu0  ;;  %v509_v37 = vpop.f32.mrb[7].mxu1 }
 0x10e   : > { %v523_v38 = vpack.c.bf16 %v477_v36, %v474_v30  ;;  %v527_v39 = vpack.c.bf16 %v509_v37, %v506_v31 }
 0x10f   : > { %532 = vst [vmem:[#allocation2 + $0x18] sm:$0xff] %v524_v34  ;;  %536 = vst [vmem:[#allocation2 + $0x38] sm:$0xff] %v528_v35 }
 0x110   : > { %531 = vst [vmem:[#allocation2 + $0x10] sm:$0xff] %v523_v38  ;;  %535 = vst [vmem:[#allocation2 + $0x30] sm:$0xff] %v527_v39 }
 0x111 PF: > { %p537_p5 = scmp.eq.s32.totalorder %s2015_s18, 1 }
 0x112   : > { %v1915_v40 = vld [vmem:[%s2560_s3] sm:$0xff] (%p537_p5)   ;;  %v1916_v41 = vld [vmem:[%s2560_s3 + $0x8] sm:$0xff] (%p537_p5)   ;;  %v1917_v42 = vld [vmem:[%s2560_s3 + $0x10] sm:$0xff] (%p537_p5)  }
 0x113   : > { %541 = sbr.rel (!%p537_p5) target bundleno = 623 (0x26f), region = 48  ;;  %1762 = vmatprep.subr.bf16.mxu0 (%p537_p5), %v1915_v40  ;;  %1842 = vmatprep.subr.bf16.mxu1 (%p537_p5), %v1915_v40  ;;  %v1918_v43 = vld [vmem:[%s2560_s3 + $0x18] sm:$0xff] (%p537_p5)   ;;  %v2142_v44 = vld [vmem:[#allocation3] sm:$0xff] (%p537_p5)  ;;  %v2144_v45 = vld [vmem:[#allocation3 + $0x8] sm:$0xff] (%p537_p5) }
 0x114   : > { %1763 = vmatpush3.bf16.msra.mxu0 (%p537_p5), %v1915_v40  ;;  %1850 = vmatpush3.bf16.msra.mxu1 (%p537_p5), %v1915_v40  ;;  %v2146_v46 = vld [vmem:[#allocation3 + $0x10] sm:$0xff] (%p537_p5)  ;;  %v2148_v47 = vld [vmem:[#allocation3 + $0x18] sm:$0xff] (%p537_p5)  ;;  %v2150_v48 = vld [vmem:[#allocation3 + $0x20] sm:$0xff] (%p537_p5)  ;;  %v576_v50 = vadd.f32 (%p537_p5), %v2144_v45, %v2142_v44 }
 0x115   : > { %1764 = vmatprep.subr.bf16.mxu0 (%p537_p5), %v1916_v41  ;;  %1843 = vmatprep.subr.bf16.mxu1 (%p537_p5), %v1916_v41  ;;  %v562_v49 = vmul.f32 (%p537_p5), 0.0, %v2146_v46  ;;  %v2155_v51 = vld [vmem:[#allocation3 + $0x28] sm:$0xff] (%p537_p5)  ;;  %v563_v52 = vmul.f32 (%p537_p5), 0.0, %v2148_v47  ;;  %v564_v53 = vmul.f32 (%p537_p5), 0.0, %v2150_v48  ;;  %v1919_v55 = vld [vmem:[%s2560_s3 + $0x20] sm:$0xff] (%p537_p5)   ;;  %v2162_v56 = vld [vmem:[#allocation3 + $0x30] sm:$0xff] (%p537_p5) }
 0x116   : > { %v565_v57 = vmul.f32 (%p537_p5), 0.0, %v2155_v51  ;;  %v2165_v59 = vld [vmem:[#allocation3 + $0x38] sm:$0xff] (%p537_p5)  ;;  %v566_v60 = vmul.f32 (%p537_p5), 0.0, %v2162_v56  ;;  %v1920_v62 = vld [vmem:[%s2560_s3 + $0x28] sm:$0xff] (%p537_p5)   ;;  %v2171_v63 = vld [vmem:[#allocation3 + $0x40] sm:$0xff] (%p537_p5) }
 0x117   : > { %v577_v54 = vadd.f32 (%p537_p5), %v576_v50, %v562_v49  ;;  %v567_v0 = vmul.f32 (%p537_p5), 0.0, %v2165_v59  ;;  %v2174_v2 = vld [vmem:[#allocation3 + $0x48] sm:$0xff] (%p537_p5)  ;;  %v568_v3 = vmul.f32 (%p537_p5), 0.0, %v2171_v63  ;;  %v1921_v5 = vld [vmem:[%s2560_s3 + $0x30] sm:$0xff] (%p537_p5)   ;;  %v2183_v9 = vld [vmem:[#allocation3 + $0x58] sm:$0xff] (%p537_p5) }
 0x118   : > { %1765 = vmatpush3.bf16.msra.mxu0 (%p537_p5), %v1916_v41  ;;  %1851 = vmatpush3.bf16.msra.mxu1 (%p537_p5), %v1916_v41  ;;  %v2180_v6 = vld [vmem:[#allocation3 + $0x50] sm:$0xff] (%p537_p5)  ;;  %v569_v7 = vmul.f32 (%p537_p5), 0.0, %v2174_v2  ;;  %v1922_v12 = vld [vmem:[%s2560_s3 + $0x38] sm:$0xff] (%p537_p5)   ;;  %v554_v13 = vld [vmem:[#allocation3 + $0x60] sm:$0xff] (%p537_p5)  ;;  %v571_v14 = vmul.f32 (%p537_p5), 0.0, %v2183_v9 }
 0x119   : > { %1766 = vmatprep.subr.bf16.mxu0 (%p537_p5), %v1917_v42  ;;  %1844 = vmatprep.subr.bf16.mxu1 (%p537_p5), %v1917_v42  ;;  %v578_v58 = vadd.f32 (%p537_p5), %v577_v54, %v563_v52  ;;  %v570_v10 = vmul.f32 (%p537_p5), 0.0, %v2180_v6  ;;  %v2190_v16 = vld [vmem:[#allocation3 + $0x68] sm:$0xff] (%p537_p5)  ;;  %v572_v17 = vmul.f32 (%p537_p5), 0.0, %v554_v13  ;;  %v556_v19 = vld [vmem:[#allocation3 + $0x70] sm:$0xff] (%p537_p5)  ;;  %v557_v22 = vld [vmem:[#allocation3 + $0x78] sm:$0xff] (%p537_p5) }
 0x11a   : > { %v573_v20 = vmul.f32 0.0, %v2190_v16  ;;  %v574_v23 = vmul.f32 0.0, %v556_v19  ;;  %v575_v25 = vmul.f32 0.0, %v557_v22 }
 0x11b   : > { %v579_v61 = vadd.f32 %v578_v58, %v564_v53 }
 0x11c   : > { %1767 = vmatpush3.bf16.msra.mxu0 %v1917_v42  ;;  %1852 = vmatpush3.bf16.msra.mxu1 %v1917_v42 }
 0x11d   : > { %1768 = vmatprep.subr.bf16.mxu0 %v1918_v43  ;;  %1845 = vmatprep.subr.bf16.mxu1 %v1918_v43  ;;  %v580_v1 = vadd.f32 %v579_v61, %v565_v57 }
 0x11f   : > { %v581_v4 = vadd.f32 %v580_v1, %v566_v60 }
 0x120   : > { %1769 = vmatpush3.bf16.msra.mxu0 %v1918_v43  ;;  %1853 = vmatpush3.bf16.msra.mxu1 %v1918_v43 }
 0x121   : > { %1770 = vmatprep.subr.bf16.mxu0 %v1919_v55  ;;  %1846 = vmatprep.subr.bf16.mxu1 %v1919_v55  ;;  %v582_v8 = vadd.f32 %v581_v4, %v567_v0 }
 0x123   : > { %v583_v11 = vadd.f32 %v582_v8, %v568_v3 }
 0x124   : > { %1771 = vmatpush3.bf16.msra.mxu0 %v1919_v55  ;;  %1854 = vmatpush3.bf16.msra.mxu1 %v1919_v55 }
 0x125   : > { %1772 = vmatprep.subr.bf16.mxu0 %v1920_v62  ;;  %1847 = vmatprep.subr.bf16.mxu1 %v1920_v62  ;;  %v584_v15 = vadd.f32 %v583_v11, %v569_v7 }
 0x127   : > { %v585_v18 = vadd.f32 %v584_v15, %v570_v10 }
 0x128   : > { %1773 = vmatpush3.bf16.msra.mxu0 %v1920_v62  ;;  %1855 = vmatpush3.bf16.msra.mxu1 %v1920_v62 }
 0x129   : > { %1774 = vmatprep.subr.bf16.mxu0 %v1921_v5  ;;  %1848 = vmatprep.subr.bf16.mxu1 %v1921_v5  ;;  %v586_v21 = vadd.f32 %v585_v18, %v571_v14 }
 0x12b   : > { %v587_v24 = vadd.f32 %v586_v21, %v572_v17 }
 0x12c   : > { %1775 = vmatpush3.bf16.msra.mxu0 %v1921_v5  ;;  %1856 = vmatpush3.bf16.msra.mxu1 %v1921_v5 }
 0x12d   : > { %1776 = vmatprep.subr.bf16.mxu0 %v1922_v12  ;;  %1849 = vmatprep.subr.bf16.mxu1 %v1922_v12  ;;  %v588_v26 = vadd.f32 %v587_v24, %v573_v20 }
 0x12f   : > { %v589_v27 = vadd.f32 %v588_v26, %v574_v23 }
 0x130   : > { %1777 = vmatpush3.bf16.msra.mxu0 %v1922_v12  ;;  %1857 = vmatpush3.bf16.msra.mxu1 %v1922_v12 }
 0x131   : > { %v590_v28 = vadd.f32 %v589_v27, %v575_v25 }
 0x133   : > { %v591_v29 = vrot.slane %v590_v28, 4 }
 0x135   : > { %v592_v30 = vadd.f32 %v591_v29, %v590_v28 }
 0x137   : > { %v593_v31 = vrot.slane %v592_v30, 2 }
 0x139   : > { %v594_v32 = vadd.f32 %v593_v31, %v592_v30 }
 0x13b   : > { %v595_v33 = vrot.slane %v594_v32, 1 }
 0x13d   : > { %v596_v34 = vadd.f32 %v595_v33, %v594_v32 }
 0x13f   : > { %v597_v35 = vmul.f32 0.0625, %v596_v34 }
 0x141   : > { %v2194_v36 = vsub.f32 %v2146_v46, %v597_v35  ;;  %v2197_v37 = vsub.f32 %v2142_v44, %v597_v35  ;;  %v2200_v38 = vsub.f32 %v2144_v45, %v597_v35  ;;  %v2203_v39 = vsub.f32 %v2148_v47, %v597_v35 }
 0x142   : > { %v2206_v40 = vsub.f32 %v2150_v48, %v597_v35  ;;  %v2210_v42 = vsub.f32 %v2155_v51, %v597_v35  ;;  %v2218_v46 = vsub.f32 %v2162_v56, %v597_v35  ;;  %v2222_v49 = vsub.f32 %v2165_v59, %v597_v35 }
 0x143   : > { %v616_v41 = vmul.f32 0.0, %v2194_v36  ;;  %v617_v43 = vmul.f32 0.0, %v2203_v39  ;;  %v630_v44 = vmul.f32 %v2197_v37, %v2197_v37  ;;  %v631_v45 = vmul.f32 %v2200_v38, %v2200_v38 }
 0x144   : > { %v618_v47 = vmul.f32 0.0, %v2206_v40  ;;  %v619_v50 = vmul.f32 0.0, %v2210_v42  ;;  %v606_v53 = vsub.f32 %v2171_v63, %v597_v35  ;;  %v620_v54 = vmul.f32 0.0, %v2218_v46 }
 0x145   : > { %v632_v48 = vmul.f32 %v616_v41, %v616_v41  ;;  %v633_v51 = vmul.f32 %v617_v43, %v617_v43  ;;  %v646_v52 = vadd.f32 %v631_v45, %v630_v44  ;;  %v607_v58 = vsub.f32 %v2174_v2, %v597_v35 }
 0x146   : > { %v634_v55 = vmul.f32 %v618_v47, %v618_v47  ;;  %v621_v56 = vmul.f32 0.0, %v2222_v49  ;;  %v635_v60 = vmul.f32 %v619_v50, %v619_v50  ;;  %v608_v62 = vsub.f32 %v2180_v6, %v597_v35  ;;  %v2247_v50 = vld [vmem:[%s2561_s4 + $0x1] ss:$0 sm:$0xff] }
 0x147   : > { %v647_v57 = vadd.f32 %v646_v52, %v632_v48  ;;  %v622_v59 = vmul.f32 0.0, %v606_v53  ;;  %v636_v0 = vmul.f32 %v620_v54, %v620_v54  ;;  %v609_v3 = vsub.f32 %v2183_v9, %v597_v35 }
 0x148   : > { %v623_v4 = vmul.f32 0.0, %v607_v58  ;;  %v637_v5 = vmul.f32 %v621_v56, %v621_v56  ;;  %v2231_v7 = vsub.f32 %v554_v13, %v597_v35  ;;  %v624_v8 = vmul.f32 0.0, %v608_v62 }
 0x149   : > { %v648_v61 = vadd.f32 %v647_v57, %v633_v51  ;;  %v638_v10 = vmul.f32 %v622_v59, %v622_v59  ;;  %v2234_v2 = vsub.f32 %v2190_v16, %v597_v35  ;;  %v625_v12 = vmul.f32 0.0, %v609_v3  ;;  %v2254_v57 = vld [vmem:[%s2561_s4 + $0x2] ss:$0 sm:$0xff] }
 0x14a   : > { %v639_v14 = vmul.f32 %v623_v4, %v623_v4  ;;  %v2236_v6 = vsub.f32 %v556_v19, %v597_v35  ;;  %v626_v17 = vmul.f32 0.0, %v2231_v7  ;;  %v640_v18 = vmul.f32 %v624_v8, %v624_v8 }
 0x14b   : > { %v649_v1 = vadd.f32 %v648_v61, %v634_v55  ;;  %v2239_v20 = vsub.f32 %v557_v22, %v597_v35  ;;  %v627_v13 = vmul.f32 0.0, %v2234_v2  ;;  %v641_v21 = vmul.f32 %v625_v12, %v625_v12 }
 0x14c   : > { %v628_v24 = vmul.f32 0.0, %v2236_v6  ;;  %v642_v25 = vmul.f32 %v626_v17, %v626_v17 }
 0x14d   : > { %v650_v63 = vadd.f32 %v649_v1, %v635_v60  ;;  %v629_v26 = vmul.f32 0.0, %v2239_v20  ;;  %v643_v27 = vmul.f32 %v627_v13, %v627_v13 }
 0x14e   : > { %v644_v19 = vmul.f32 %v628_v24, %v628_v24 }
 0x14f   : > { %v651_v11 = vadd.f32 %v650_v63, %v636_v0  ;;  %v645_v30 = vmul.f32 %v629_v26, %v629_v26 }
 0x151   : > { %v652_v15 = vadd.f32 %v651_v11, %v637_v5 }
 0x153   : > { %v653_v9 = vadd.f32 %v652_v15, %v638_v10 }
 0x155   : > { %v654_v23 = vadd.f32 %v653_v9, %v639_v14 }
 0x157   : > { %v655_v16 = vadd.f32 %v654_v23, %v640_v18 }
 0x159   : > { %v656_v28 = vadd.f32 %v655_v16, %v641_v21 }
 0x15b   : > { %v657_v29 = vadd.f32 %v656_v28, %v642_v25 }
 0x15d   : > { %v658_v31 = vadd.f32 %v657_v29, %v643_v27 }
 0x15f   : > { %v659_v32 = vadd.f32 %v658_v31, %v644_v19 }
 0x161   : > { %v660_v33 = vadd.f32 %v659_v32, %v645_v30 }
 0x163   : > { %v661_v22 = vrot.slane %v660_v33, 4 }
 0x165   : > { %v662_v34 = vadd.f32 %v661_v22, %v660_v33 }
 0x167   : > { %v663_v35 = vrot.slane %v662_v34, 2 }
 0x169   : > { %v664_v41 = vadd.f32 %v663_v35, %v662_v34 }
 0x16b   : > { %v665_v43 = vrot.slane %v664_v41, 1 }
 0x16d   : > { %v666_v44 = vadd.f32 %v665_v43, %v664_v41 }
 0x16f   : > { %v667_v45 = vmul.f32 0.0625, %v666_v44 }
 0x171   : > { %v668_v47 = vadd.f32 1e-05, %v667_v45 }
 0x173   : > { %1923 = vrsqrt.f32 %v668_v47 }
 0x17d   : > { %v1924_v48 = vpop.eup %1923 }
 0x17e   : > { %v670_v51 = vmul.f32 %v1924_v48, %v2197_v37  ;;  %v671_v52 = vmul.f32 %v1924_v48, %v2200_v38  ;;  %v678_v54 = vmul.f32 %v1924_v48, %v606_v53  ;;  %v679_v55 = vmul.f32 %v1924_v48, %v607_v58 }
 0x17f   : > { %v672_v56 = vmul.f32 %v1924_v48, %v2194_v36  ;;  %v673_v60 = vmul.f32 %v1924_v48, %v2203_v39  ;;  %v680_v61 = vmul.f32 %v1924_v48, %v608_v62  ;;  %v681_v59 = vmul.f32 %v1924_v48, %v609_v3 }
 0x180   : > { %v690_v0 = vmul.f32 %v2247_v50, %v670_v51  ;;  %v691_v1 = vmul.f32 %v2247_v50, %v671_v52  ;;  %v698_v37 = vmul.f32 %v2247_v50, %v678_v54  ;;  %v699_v38 = vmul.f32 %v2247_v50, %v679_v55 }
 0x181   : > { %v692_v53 = vmul.f32 %v2247_v50, %v672_v56  ;;  %v693_v58 = vmul.f32 %v2247_v50, %v673_v60  ;;  %v700_v4 = vmul.f32 %v2247_v50, %v680_v61  ;;  %v701_v36 = vmul.f32 %v2247_v50, %v681_v59 }
 0x182   : > { %v710_v39 = vadd.f32 %v2254_v57, %v690_v0  ;;  %v711_v62 = vadd.f32 %v2254_v57, %v691_v1  ;;  %v718_v3 = vadd.f32 %v2254_v57, %v698_v37  ;;  %v719_v5 = vadd.f32 %v2254_v57, %v699_v38 }
 0x183   : > { %v712_v63 = vadd.f32 %v2254_v57, %v692_v53  ;;  %v713_v8 = vadd.f32 %v2254_v57, %v693_v58  ;;  %v720_v10 = vadd.f32 %v2254_v57, %v700_v4  ;;  %v721_v11 = vadd.f32 %v2254_v57, %v701_v36 }
 0x184   : > { %v726_v12 = vmax.f32 %v710_v39, 0.0  ;;  %v727_v14 = vmax.f32 %v711_v62, 0.0  ;;  %v734_v15 = vmax.f32 %v718_v3, 0.0  ;;  %v735_v17 = vmax.f32 %v719_v5, 0.0 }
 0x185   : > { %v728_v18 = vmax.f32 %v712_v63, 0.0  ;;  %v729_v9 = vmax.f32 %v713_v8, 0.0  ;;  %v736_v13 = vmax.f32 %v720_v10, 0.0  ;;  %v737_v21 = vmax.f32 %v721_v11, 0.0 }
 0x186   : > { %v742_v23 = vpack.c.bf16 %v727_v14, %v726_v12  ;;  %v746_v24 = vpack.c.bf16 %v735_v17, %v734_v15  ;;  %v674_v25 = vmul.f32 %v1924_v48, %v2206_v40  ;;  %v675_v16 = vmul.f32 %v1924_v48, %v2210_v42 }
 0x187   : > { %v743_v26 = vpack.c.bf16 %v729_v9, %v728_v18  ;;  %v747_v27 = vpack.c.bf16 %v737_v21, %v736_v13  ;;  %v682_v28 = vmul.f32 %v1924_v48, %v2231_v7  ;;  %v683_v19 = vmul.f32 %v1924_v48, %v2234_v2 }
 0x188   : > { %1778 = vmatprep.mubr.bf16.mxu0 %v742_v23  ;;  %1786 = vmatprep.mubr.bf16.mxu1 %v746_v24  ;;  %v694_v29 = vmul.f32 %v2247_v50, %v674_v25  ;;  %v695_v30 = vmul.f32 %v2247_v50, %v675_v16  ;;  %v676_v31 = vmul.f32 %v1924_v48, %v2218_v46 }
 0x189   : > { %1779 = vmatmul.mubr.bf16.vlgmr.msra.gmra.mrb[0].mxu0 %v743_v26  ;;  %1787 = vmatmul.mubr.bf16.vlgmr.msra.gmra.mrb[0].mxu1 %v747_v27  ;;  %v702_v40 = vmul.f32 %v2247_v50, %v682_v28  ;;  %v703_v42 = vmul.f32 %v2247_v50, %v683_v19  ;;  %v677_v32 = vmul.f32 %v1924_v48, %v2222_v49 }
 0x18a   : > { %v714_v7 = vadd.f32 %v2254_v57, %v694_v29  ;;  %v715_v2 = vadd.f32 %v2254_v57, %v695_v30  ;;  %v696_v33 = vmul.f32 %v2247_v50, %v676_v31  ;;  %v684_v22 = vmul.f32 %v1924_v48, %v2236_v6 }
 0x18b   : > { %v722_v34 = vadd.f32 %v2254_v57, %v702_v40  ;;  %v723_v46 = vadd.f32 %v2254_v57, %v703_v42  ;;  %v697_v35 = vmul.f32 %v2247_v50, %v677_v32  ;;  %v685_v41 = vmul.f32 %v1924_v48, %v2239_v20 }
 0x18c   : > { %v730_v43 = vmax.f32 %v714_v7, 0.0  ;;  %v731_v44 = vmax.f32 %v715_v2, 0.0  ;;  %v716_v49 = vadd.f32 %v2254_v57, %v696_v33  ;;  %v704_v45 = vmul.f32 %v2247_v50, %v684_v22 }
 0x18d   : > { %v738_v47 = vmax.f32 %v722_v34, 0.0  ;;  %v739_v51 = vmax.f32 %v723_v46, 0.0  ;;  %v717_v52 = vadd.f32 %v2254_v57, %v697_v35  ;;  %v705_v6 = vmul.f32 %v2247_v50, %v685_v41 }
 0x18e   : > { %v744_v54 = vpack.c.bf16 %v731_v44, %v730_v43  ;;  %v732_v55 = vmax.f32 %v716_v49, 0.0  ;;  %v724_v56 = vadd.f32 %v2254_v57, %v704_v45 }
 0x18f   : > { %v748_v60 = vpack.c.bf16 %v739_v51, %v738_v47  ;;  %v733_v61 = vmax.f32 %v717_v52, 0.0  ;;  %v725_v20 = vadd.f32 %v2254_v57, %v705_v6 }
 0x190   : > { %1782 = vmatprep.mubr.bf16.mxu0 %v744_v54  ;;  %v740_v48 = vmax.f32 %v724_v56, 0.0 }
 0x191   : > { %1790 = vmatprep.mubr.bf16.mxu1 %v748_v60  ;;  %v745_v59 = vpack.c.bf16 %v733_v61, %v732_v55  ;;  %v741_v0 = vmax.f32 %v725_v20, 0.0 }
 0x193   : > { %1783 = vmatmul.mubr.bf16.gmra.mrb[4].mxu0 %v745_v59  ;;  %v749_v1 = vpack.c.bf16 %v741_v0, %v740_v48 }
 0x195   : > { %1791 = vmatmul.mubr.bf16.gmra.mrb[4].mxu1 %v749_v1 }
 0x25c   : > { %v1780_v37 = vpop.f32.mrb[0].mxu0  ;;  %v1788_v38 = vpop.f32.mrb[0].mxu1 }
 0x25d   : > { %v848_v53 = vpop.f32.mrb[1].mxu0  ;;  %v880_v50 = vpop.f32.mrb[1].mxu1 }
 0x25e   : > { %v1781_v58 = vpop.f32.mrb[2].mxu0  ;;  %v1789_v4 = vpop.f32.mrb[2].mxu1 }
 0x25f   : > { %v912_v36 = vpack.c.bf16 %v1781_v58, %v1780_v37  ;;  %v916_v39 = vpack.c.bf16 %v1789_v4, %v1788_v38  ;;  %v851_v62 = vpop.f32.mrb[3].mxu0  ;;  %v883_v3 = vpop.f32.mrb[3].mxu1 }
 0x260   : > { %v911_v5 = vpack.c.bf16 %v851_v62, %v848_v53  ;;  %v915_v57 = vpack.c.bf16 %v883_v3, %v880_v50 }
 0x261   : > { %920 = vst [vmem:[#allocation2 + $0x8] sm:$0xff] %v912_v36  ;;  %924 = vst [vmem:[#allocation2 + $0x28] sm:$0xff] %v916_v39 }
 0x262   : > { %919 = vst [vmem:[#allocation2] sm:$0xff] %v911_v5  ;;  %923 = vst [vmem:[#allocation2 + $0x20] sm:$0xff] %v915_v57 }
 0x266   : > { %v1784_v63 = vpop.f32.mrb[4].mxu0 }
 0x267   : > { %v864_v8 = vpop.f32.mrb[5].mxu0 }
 0x268   : > { %v1792_v10 = vpop.f32.mrb[4].mxu1  ;;  %v1785_v11 = vpop.f32.mrb[6].mxu0 }
 0x269   : > { %v896_v12 = vpop.f32.mrb[5].mxu1  ;;  %v914_v14 = vpack.c.bf16 %v1785_v11, %v1784_v63  ;;  %v867_v15 = vpop.f32.mrb[7].mxu0 }
 0x26a   : > { %v1793_v17 = vpop.f32.mrb[6].mxu1  ;;  %v913_v18 = vpack.c.bf16 %v867_v15, %v864_v8 }
 0x26b   : > { %922 = vst [vmem:[#allocation2 + $0x18] sm:$0xff] %v914_v14  ;;  %v918_v9 = vpack.c.bf16 %v1793_v17, %v1792_v10  ;;  %v899_v13 = vpop.f32.mrb[7].mxu1 }
 0x26c   : > { %921 = vst [vmem:[#allocation2 + $0x10] sm:$0xff] %v913_v18  ;;  %v917_v21 = vpack.c.bf16 %v899_v13, %v896_v12 }
 0x26d   : > { %926 = vst [vmem:[#allocation2 + $0x38] sm:$0xff] %v918_v9 }
 0x26e   : > { %925 = vst [vmem:[#allocation2 + $0x30] sm:$0xff] %v917_v21 }
 0x26f PF: > { %v943_v23 = vld [vmem:[#allocation2] sm:$0xff]  ;;  %v944_v24 = vld [vmem:[#allocation2 + $0x8] sm:$0xff]  ;;  %v1929_v42 = vld [vmem:[%s2557_s0 + $0x10] sm:$0xff]   ;;  %s953_s27 = scalar_select %p290_p4, 1, 0  ;;  %v958_v33 = vlaneseq }
 0x270   : > { %1794 = vmatprep.subr.bf16.mxu0 %v943_v23  ;;  %1858 = vmatprep.subr.bf16.mxu1 %v943_v23  ;;  %v1925_v16 = vld [vmem:[%s2557_s0] sm:$0xff]   ;;  %v948_v19 = vld [vmem:[#allocation2 + $0x28] sm:$0xff]  ;;  %v1930_v32 = vld [vmem:[%s2557_s0 + $0x30] sm:$0xff]  }
 0x271   : > { %1795 = vmatpush3.bf16.msra.mxu0 %v943_v23  ;;  %1866 = vmatpush3.bf16.msra.mxu1 %v943_v23  ;;  %v1926_v26 = vld [vmem:[%s2557_s0 + $0x20] sm:$0xff]   ;;  %v1927_v31 = vld [vmem:[%s2557_s0 + $0x8] sm:$0xff]   ;;  %v1931_v7 = vld [vmem:[%s2557_s0 + $0x18] sm:$0xff]   ;;  %v954_v22 = vstv %s953_s27  ;;  %v959_v34 = vshrl.u32 %v958_v33, 7 }
 0x272   : > { %1796 = vmatprep.subr.bf16.mxu0 %v944_v24  ;;  %1859 = vmatprep.subr.bf16.mxu1 %v944_v24  ;;  %v946_v27 = vld [vmem:[#allocation2 + $0x18] sm:$0xff]  ;;  %v947_v28 = vld [vmem:[#allocation2 + $0x20] sm:$0xff]  ;;  %v1928_v40 = vld [vmem:[%s2557_s0 + $0x28] sm:$0xff]   ;;  %vm955_vm0 = vcmp.eq.s32.totalorder %v954_v22, 1 }
 0x273   : > { %v945_v25 = vld [vmem:[#allocation2 + $0x10] sm:$0xff]  ;;  %1810 = vmatprep.mubr.bf16.mxu0 %v1925_v16  ;;  %1818 = vmatprep.mubr.bf16.mxu1 %v1926_v26  ;;  %v1932_v2 = vld [vmem:[%s2557_s0 + $0x38] sm:$0xff]   ;;  %v951_v46 = vld [vmem:[%s2561_s4] sm:$0x1]  ;;  %v960_v41 = vsub.s32 0, %v959_v34 }
 0x274   : > { %v950_v30 = vld [vmem:[#allocation2 + $0x38] sm:$0xff]  ;;  %v952_v35 = vld [vmem:[%s2561_s4 + $0x3] sm:$0x1] }
 0x275   : > { %1797 = vmatpush3.bf16.msra.mxu0 %v944_v24  ;;  %1867 = vmatpush3.bf16.msra.mxu1 %v944_v24  ;;  %v949_v29 = vld [vmem:[#allocation2 + $0x30] sm:$0xff]  ;;  %v956_v43 = vsel %vm955_vm0, %v951_v46, %v952_v35 }
 0x276   : > { %1798 = vmatprep.subr.bf16.mxu0 %v945_v25  ;;  %1860 = vmatprep.subr.bf16.mxu1 %v945_v25  ;;  %v961_v44 = vrot.slane %v956_v43, %v960_v41 }
 0x279   : > { %1799 = vmatpush3.bf16.msra.mxu0 %v945_v25  ;;  %1868 = vmatpush3.bf16.msra.mxu1 %v945_v25 }
 0x27a   : > { %1800 = vmatprep.subr.bf16.mxu0 %v946_v27  ;;  %1861 = vmatprep.subr.bf16.mxu1 %v946_v27 }
 0x27d   : > { %1801 = vmatpush3.bf16.msra.mxu0 %v946_v27  ;;  %1869 = vmatpush3.bf16.msra.mxu1 %v946_v27 }
 0x27e   : > { %1802 = vmatprep.subr.bf16.mxu0 %v947_v28  ;;  %1862 = vmatprep.subr.bf16.mxu1 %v947_v28 }
 0x281   : > { %1803 = vmatpush3.bf16.msra.mxu0 %v947_v28  ;;  %1870 = vmatpush3.bf16.msra.mxu1 %v947_v28 }
 0x282   : > { %1804 = vmatprep.subr.bf16.mxu0 %v948_v19  ;;  %1863 = vmatprep.subr.bf16.mxu1 %v948_v19 }
 0x285   : > { %1805 = vmatpush3.bf16.msra.mxu0 %v948_v19  ;;  %1871 = vmatpush3.bf16.msra.mxu1 %v948_v19 }
 0x286   : > { %1806 = vmatprep.subr.bf16.mxu0 %v949_v29  ;;  %1864 = vmatprep.subr.bf16.mxu1 %v949_v29 }
 0x289   : > { %1807 = vmatpush3.bf16.msra.mxu0 %v949_v29  ;;  %1872 = vmatpush3.bf16.msra.mxu1 %v949_v29 }
 0x28a   : > { %1808 = vmatprep.subr.bf16.mxu0 %v950_v30  ;;  %1865 = vmatprep.subr.bf16.mxu1 %v950_v30 }
 0x28d   : > { %1809 = vmatpush3.bf16.msra.mxu0 %v950_v30  ;;  %1873 = vmatpush3.bf16.msra.mxu1 %v950_v30 }
 0x290   : > { %1811 = vmatmul.mubr.bf16.vlgmr.msra.gmra.mrb[0].mxu0 %v1927_v31  ;;  %1819 = vmatmul.mubr.bf16.vlgmr.msra.gmra.mrb[0].mxu1 %v1928_v40 }
 0x291   : > { %1814 = vmatprep.mubr.bf16.mxu0 %v1929_v42  ;;  %1822 = vmatprep.mubr.bf16.mxu1 %v1930_v32 }
 0x298   : > { %1815 = vmatmul.mubr.bf16.gmra.mrb[4].mxu0 %v1931_v7  ;;  %1823 = vmatmul.mubr.bf16.gmra.mrb[4].mxu1 %v1932_v2 }
 0x363   : > { %v1812_v49 = vpop.f32.mrb[0].mxu0  ;;  %v1820_v45 = vpop.f32.mrb[0].mxu1 }
 0x364   : > { %v1053_v47 = vadd.f32 %v1812_v49, %v961_v44  ;;  %v1085_v51 = vadd.f32 %v1820_v45, %v961_v44  ;;  %v1044_v52 = vpop.f32.mrb[1].mxu0  ;;  %v1076_v6 = vpop.f32.mrb[1].mxu1 }
 0x365   : > { %v1045_v54 = vadd.f32 %v1044_v52, %v961_v44  ;;  %v1077_v55 = vadd.f32 %v1076_v6, %v961_v44  ;;  %v1813_v56 = vpop.f32.mrb[2].mxu0  ;;  %v1821_v60 = vpop.f32.mrb[2].mxu1 }
 0x366   : > { %1110 = vst [vmem:[#allocation3 + $0x10] sm:$0xff] %v1053_v47  ;;  %1118 = vst [vmem:[#allocation3 + $0x50] sm:$0xff] %v1085_v51  ;;  %v1056_v61 = vadd.f32 %v1813_v56, %v961_v44  ;;  %v1088_v20 = vadd.f32 %v1821_v60, %v961_v44  ;;  %v1047_v48 = vpop.f32.mrb[3].mxu0  ;;  %v1079_v59 = vpop.f32.mrb[3].mxu1 }
 0x367   : > { %1108 = vst [vmem:[#allocation3] sm:$0xff] %v1045_v54  ;;  %1116 = vst [vmem:[#allocation3 + $0x40] sm:$0xff] %v1077_v55  ;;  %v1048_v0 = vadd.f32 %v1047_v48, %v961_v44  ;;  %v1080_v1 = vadd.f32 %v1079_v59, %v961_v44 }
 0x368   : > { %1111 = vst [vmem:[#allocation3 + $0x18] sm:$0xff] %v1056_v61  ;;  %1119 = vst [vmem:[#allocation3 + $0x58] sm:$0xff] %v1088_v20 }
 0x369   : > { %1109 = vst [vmem:[#allocation3 + $0x8] sm:$0xff] %v1048_v0  ;;  %1117 = vst [vmem:[#allocation3 + $0x48] sm:$0xff] %v1080_v1 }
 0x36b   : > { %v1816_v37 = vpop.f32.mrb[4].mxu0  ;;  %v1824_v38 = vpop.f32.mrb[4].mxu1  ;;  %1125 = sbr.rel (!%p537_p5) target bundleno = 1346 (0x542), region = 52 }
 0x36c   : > { %v1069_v53 = vadd.f32 %v1816_v37, %v961_v44  ;;  %v1101_v50 = vadd.f32 %v1824_v38, %v961_v44  ;;  %v1060_v58 = vpop.f32.mrb[5].mxu0  ;;  %v1092_v4 = vpop.f32.mrb[5].mxu1 }
 0x36d   : > { %v1061_v36 = vadd.f32 %v1060_v58, %v961_v44  ;;  %v1093_v39 = vadd.f32 %v1092_v4, %v961_v44  ;;  %v1817_v62 = vpop.f32.mrb[6].mxu0  ;;  %v1825_v3 = vpop.f32.mrb[6].mxu1  ;;  %v1128_v15 = vld [vmem:[#allocation3 + $0x10] sm:$0xff] (%p537_p5) }
 0x36e   : > { %1114 = vst [vmem:[#allocation3 + $0x30] sm:$0xff] %v1069_v53  ;;  %1122 = vst [vmem:[#allocation3 + $0x70] sm:$0xff] %v1101_v50  ;;  %v1072_v5 = vadd.f32 %v1817_v62, %v961_v44  ;;  %v1104_v57 = vadd.f32 %v1825_v3, %v961_v44  ;;  %v1063_v63 = vpop.f32.mrb[7].mxu0  ;;  %v1095_v8 = vpop.f32.mrb[7].mxu1  ;;  %v1126_v12 = vld [vmem:[#allocation3] sm:$0xff] (%p537_p5)  ;;  %v1146_v9 = vmul.f32 (%p537_p5), 0.0, %v1128_v15 }
 0x36f   : > { %1112 = vst [vmem:[#allocation3 + $0x20] sm:$0xff] %v1061_v36  ;;  %1120 = vst [vmem:[#allocation3 + $0x60] sm:$0xff] %v1093_v39  ;;  %v1064_v10 = vadd.f32 %v1063_v63, %v961_v44  ;;  %v1096_v11 = vadd.f32 %v1095_v8, %v961_v44  ;;  %v1129_v17 = vld [vmem:[#allocation3 + $0x18] sm:$0xff] (%p537_p5)  ;;  %v1134_v30 = vld [vmem:[#allocation3 + $0x40] sm:$0xff] (%p537_p5) }
 0x370   : > { %1115 = vst [vmem:[#allocation3 + $0x38] sm:$0xff] %v1072_v5  ;;  %1123 = vst [vmem:[#allocation3 + $0x78] sm:$0xff] %v1104_v57  ;;  %v1127_v14 = vld [vmem:[#allocation3 + $0x8] sm:$0xff] (%p537_p5)  ;;  %v1147_v23 = vmul.f32 (%p537_p5), 0.0, %v1129_v17  ;;  %v1152_v32 = vmul.f32 (%p537_p5), 0.0, %v1134_v30  ;;  %v1136_v2 = vld [vmem:[#allocation3 + $0x50] sm:$0xff] (%p537_p5) }
 0x371   : > { %1113 = vst [vmem:[#allocation3 + $0x28] sm:$0xff] %v1064_v10  ;;  %1121 = vst [vmem:[#allocation3 + $0x68] sm:$0xff] %v1096_v11  ;;  %v1160_v13 = vadd.f32 (%p537_p5), %v1127_v14, %v1126_v12  ;;  %v1135_v42 = vld [vmem:[#allocation3 + $0x48] sm:$0xff] (%p537_p5)  ;;  %v1137_v34 = vld [vmem:[#allocation3 + $0x58] sm:$0xff] (%p537_p5)  ;;  %v1154_v46 = vmul.f32 (%p537_p5), 0.0, %v1136_v2 }
 0x372   : > { %v1153_v33 = vmul.f32 0.0, %v1135_v42  ;;  %v1155_v43 = vmul.f32 0.0, %v1137_v34 }
 0x373   : > { %v1161_v25 = vadd.f32 %v1160_v13, %v1146_v9 }
 0x375   : > { %v1132_v16 = vld [vmem:[#allocation3 + $0x30] sm:$0xff]  ;;  %v1162_v27 = vadd.f32 %v1161_v25, %v1147_v23 }
 0x376   : > { %v1130_v18 = vld [vmem:[#allocation3 + $0x20] sm:$0xff]  ;;  %v1150_v19 = vmul.f32 0.0, %v1132_v16  ;;  %v1140_v51 = vld [vmem:[#allocation3 + $0x70] sm:$0xff] }
 0x377   : > { %v1148_v24 = vmul.f32 0.0, %v1130_v18  ;;  %v1133_v28 = vld [vmem:[#allocation3 + $0x38] sm:$0xff]  ;;  %v1138_v41 = vld [vmem:[#allocation3 + $0x60] sm:$0xff]  ;;  %v1158_v55 = vmul.f32 0.0, %v1140_v51 }
 0x378   : > { %v1131_v21 = vld [vmem:[#allocation3 + $0x28] sm:$0xff]  ;;  %v1151_v31 = vmul.f32 0.0, %v1133_v28  ;;  %v1156_v45 = vmul.f32 0.0, %v1138_v41  ;;  %v1141_v54 = vld [vmem:[#allocation3 + $0x78] sm:$0xff] }
 0x379   : > { %v1149_v26 = vmul.f32 0.0, %v1131_v21  ;;  %v1163_v29 = vadd.f32 %v1162_v27, %v1148_v24  ;;  %v1139_v49 = vld [vmem:[#allocation3 + $0x68] sm:$0xff]  ;;  %v1159_v60 = vmul.f32 0.0, %v1141_v54 }
 0x37a   : > { %v1157_v52 = vmul.f32 0.0, %v1139_v49 }
 0x37b   : > { %v1164_v40 = vadd.f32 %v1163_v29, %v1149_v26 }
 0x37d   : > { %v1165_v7 = vadd.f32 %v1164_v40, %v1150_v19 }
 0x37f   : > { %v1166_v22 = vadd.f32 %v1165_v7, %v1151_v31 }
 0x381   : > { %v1167_v35 = vadd.f32 %v1166_v22, %v1152_v32 }
 0x383   : > { %v1168_v44 = vadd.f32 %v1167_v35, %v1153_v33 }
 0x385   : > { %v1169_v47 = vadd.f32 %v1168_v44, %v1154_v46 }
 0x387   : > { %v1170_v6 = vadd.f32 %v1169_v47, %v1155_v43 }
 0x389   : > { %v1171_v56 = vadd.f32 %v1170_v6, %v1156_v45 }
 0x38b   : > { %v1172_v61 = vadd.f32 %v1171_v56, %v1157_v52 }
 0x38d   : > { %v1173_v20 = vadd.f32 %v1172_v61, %v1158_v55 }
 0x38f   : > { %v1174_v48 = vadd.f32 %v1173_v20, %v1159_v60 }
 0x391   : > { %v1175_v59 = vrot.slane %v1174_v48, 4 }
 0x393   : > { %v1176_v0 = vadd.f32 %v1175_v59, %v1174_v48 }
 0x395   : > { %v1177_v1 = vrot.slane %v1176_v0, 2 }
 0x397   : > { %v1178_v37 = vadd.f32 %v1177_v1, %v1176_v0 }
 0x399   : > { %v1179_v38 = vrot.slane %v1178_v37, 1 }
 0x39b   : > { %v1180_v53 = vadd.f32 %v1179_v38, %v1178_v37 }
 0x39d   : > { %v1181_v50 = vmul.f32 0.0625, %v1180_v53 }
 0x39f   : > { %v2332_v58 = vsub.f32 %v1128_v15, %v1181_v50  ;;  %v2334_v4 = vsub.f32 %v1126_v12, %v1181_v50  ;;  %v2336_v36 = vsub.f32 %v1127_v14, %v1181_v50  ;;  %v2338_v39 = vsub.f32 %v1129_v17, %v1181_v50 }
 0x3a0   : > { %v2340_v62 = vsub.f32 %v1130_v18, %v1181_v50  ;;  %v2343_v5 = vsub.f32 %v1131_v21, %v1181_v50  ;;  %v2350_v10 = vsub.f32 %v1132_v16, %v1181_v50  ;;  %v2353_v14 = vsub.f32 %v1133_v28, %v1181_v50 }
 0x3a1   : > { %v1200_v3 = vmul.f32 0.0, %v2332_v58  ;;  %v1201_v57 = vmul.f32 0.0, %v2338_v39  ;;  %v1214_v63 = vmul.f32 %v2334_v4, %v2334_v4  ;;  %v1215_v8 = vmul.f32 %v2336_v36, %v2336_v36 }
 0x3a2   : > { %v1202_v11 = vmul.f32 0.0, %v2340_v62  ;;  %v1203_v15 = vmul.f32 0.0, %v2343_v5  ;;  %v2356_v9 = vsub.f32 %v1134_v30, %v1181_v50  ;;  %v1204_v13 = vmul.f32 0.0, %v2350_v10 }
 0x3a3   : > { %v1216_v12 = vmul.f32 %v1200_v3, %v1200_v3  ;;  %v1217_v17 = vmul.f32 %v1201_v57, %v1201_v57  ;;  %v1230_v18 = vadd.f32 %v1215_v8, %v1214_v63  ;;  %v2359_v24 = vsub.f32 %v1135_v42, %v1181_v50 }
 0x3a4   : > { %v1218_v21 = vmul.f32 %v1202_v11, %v1202_v11  ;;  %v1205_v25 = vmul.f32 0.0, %v2353_v14  ;;  %v1219_v16 = vmul.f32 %v1203_v15, %v1203_v15  ;;  %v2362_v27 = vsub.f32 %v1136_v2, %v1181_v50  ;;  %v2387_v15 = vld [vmem:[%s2561_s4 + $0x4] ss:$0 sm:$0xff] }
 0x3a5   : > { %v1231_v23 = vadd.f32 %v1230_v18, %v1216_v12  ;;  %v1206_v28 = vmul.f32 0.0, %v2356_v9  ;;  %v1220_v19 = vmul.f32 %v1204_v13, %v1204_v13  ;;  %v2365_v31 = vsub.f32 %v1137_v34, %v1181_v50 }
 0x3a6   : > { %v1207_v30 = vmul.f32 0.0, %v2359_v24  ;;  %v1221_v40 = vmul.f32 %v1205_v25, %v1205_v25  ;;  %v2368_v7 = vsub.f32 %v1138_v41, %v1181_v50  ;;  %v1208_v42 = vmul.f32 0.0, %v2362_v27 }
 0x3a7   : > { %v1232_v26 = vadd.f32 %v1231_v23, %v1217_v17  ;;  %v1222_v33 = vmul.f32 %v1206_v28, %v1206_v28  ;;  %v2371_v46 = vsub.f32 %v1139_v49, %v1181_v50  ;;  %v1209_v2 = vmul.f32 0.0, %v2365_v31  ;;  %v2400_v23 = vld [vmem:[%s2561_s4 + $0x5] ss:$0 sm:$0xff] }
 0x3a8   : > { %v1223_v35 = vmul.f32 %v1207_v30, %v1207_v30  ;;  %v2374_v44 = vsub.f32 %v1140_v51, %v1181_v50  ;;  %v1210_v34 = vmul.f32 0.0, %v2368_v7  ;;  %v1224_v45 = vmul.f32 %v1208_v42, %v1208_v42 }
 0x3a9   : > { %v1233_v29 = vadd.f32 %v1232_v26, %v1218_v21  ;;  %v2377_v52 = vsub.f32 %v1141_v54, %v1181_v50  ;;  %v1211_v41 = vmul.f32 0.0, %v2371_v46  ;;  %v1225_v6 = vmul.f32 %v1209_v2, %v1209_v2 }
 0x3aa   : > { %v1212_v56 = vmul.f32 0.0, %v2374_v44  ;;  %v1226_v49 = vmul.f32 %v1210_v34, %v1210_v34 }
 0x3ab   : > { %v1234_v32 = vadd.f32 %v1233_v29, %v1219_v16  ;;  %v1213_v61 = vmul.f32 0.0, %v2377_v52  ;;  %v1227_v20 = vmul.f32 %v1211_v41, %v1211_v41 }
 0x3ac   : > { %v1228_v51 = vmul.f32 %v1212_v56, %v1212_v56 }
 0x3ad   : > { %v1235_v22 = vadd.f32 %v1234_v32, %v1220_v19  ;;  %v1229_v0 = vmul.f32 %v1213_v61, %v1213_v61  ;;  %v2424_v32 = vld [vmem:[%s2561_s4 + $0x6] ss:$0 sm:$0xff] }
 0x3af   : > { %v1236_v43 = vadd.f32 %v1235_v22, %v1221_v40 }
 0x3b1   : > { %v1237_v47 = vadd.f32 %v1236_v43, %v1222_v33 }
 0x3b3   : > { %v1238_v55 = vadd.f32 %v1237_v47, %v1223_v35 }
 0x3b5   : > { %v1239_v60 = vadd.f32 %v1238_v55, %v1224_v45 }
 0x3b7   : > { %v1240_v48 = vadd.f32 %v1239_v60, %v1225_v6 }
 0x3b9   : > { %v1241_v59 = vadd.f32 %v1240_v48, %v1226_v49 }
 0x3bb   : > { %v1242_v1 = vadd.f32 %v1241_v59, %v1227_v20 }
 0x3bd   : > { %v1243_v37 = vadd.f32 %v1242_v1, %v1228_v51 }
 0x3bf   : > { %v1244_v38 = vadd.f32 %v1243_v37, %v1229_v0 }
 0x3c1   : > { %v1245_v54 = vrot.slane %v1244_v38, 4 }
 0x3c3   : > { %v1246_v53 = vadd.f32 %v1245_v54, %v1244_v38 }
 0x3c5   : > { %v1247_v50 = vrot.slane %v1246_v53, 2 }
 0x3c7   : > { %v1248_v3 = vadd.f32 %v1247_v50, %v1246_v53 }
 0x3c9   : > { %v1249_v57 = vrot.slane %v1248_v3, 1 }
 0x3cb   : > { %v1250_v63 = vadd.f32 %v1249_v57, %v1248_v3 }
 0x3cd   : > { %v1251_v8 = vmul.f32 0.0625, %v1250_v63 }
 0x3cf   : > { %v1252_v11 = vadd.f32 1e-05, %v1251_v8 }
 0x3d1   : > { %1935 = vrsqrt.f32 %v1252_v11 }
 0x3db   : > { %v2382_v12 = vpop.eup %1935 }
 0x3dc   : > { %v1256_v17 = vmul.f32 %v2382_v12, %v2332_v58  ;;  %v1254_v18 = vmul.f32 %v2382_v12, %v2334_v4  ;;  %v1257_v13 = vmul.f32 %v2382_v12, %v2338_v39  ;;  %v1255_v21 = vmul.f32 %v2382_v12, %v2336_v36 }
 0x3dd   : > { %v1259_v25 = vmul.f32 %v2382_v12, %v2343_v5  ;;  %v1261_v58 = vmul.f32 %v2382_v12, %v2353_v14  ;;  %v1258_v4 = vmul.f32 %v2382_v12, %v2340_v62  ;;  %v1263_v5 = vmul.f32 %v2382_v12, %v2359_v24 }
 0x3de   : > { %v1276_v16 = vmul.f32 %v2387_v15, %v1256_v17  ;;  %v1274_v39 = vmul.f32 %v2387_v15, %v1254_v18  ;;  %v1277_v36 = vmul.f32 %v2387_v15, %v1257_v13  ;;  %v1275_v26 = vmul.f32 %v2387_v15, %v1255_v21 }
 0x3df   : > { %v1279_v28 = vmul.f32 %v2387_v15, %v1259_v25  ;;  %v1281_v19 = vmul.f32 %v2387_v15, %v1261_v58  ;;  %v1278_v14 = vmul.f32 %v2387_v15, %v1258_v4  ;;  %v1283_v43 = vmul.f32 %v2387_v15, %v1263_v5 }
 0x3e0   : > { %v1296_v29 = vadd.f32 %v2400_v23, %v1276_v16  ;;  %v1294_v62 = vadd.f32 %v2400_v23, %v1274_v39  ;;  %v1297_v30 = vadd.f32 %v2400_v23, %v1277_v36  ;;  %v1295_v40 = vadd.f32 %v2400_v23, %v1275_v26 }
 0x3e1   : > { %v1299_v42 = vadd.f32 %v2400_v23, %v1279_v28  ;;  %v1298_v33 = vadd.f32 %v2400_v23, %v1278_v14  ;;  %v1301_v41 = vadd.f32 %v2400_v23, %v1281_v19  ;;  %v1265_v49 = vmul.f32 %v2382_v12, %v2365_v31 }
 0x3e2   : > { %v1312_v24 = vmax.f32 %v1296_v29, 0.0  ;;  %v1310_v22 = vmax.f32 %v1294_v62, 0.0  ;;  %v1313_v2 = vmax.f32 %v1297_v30, 0.0  ;;  %v1311_v35 = vmax.f32 %v1295_v40, 0.0 }
 0x3e3   : > { %v1315_v47 = vmax.f32 %v1299_v42, 0.0  ;;  %v1314_v55 = vmax.f32 %v1298_v33, 0.0  ;;  %v1260_v60 = vmul.f32 %v2382_v12, %v2350_v10  ;;  %v1262_v61 = vmul.f32 %v2382_v12, %v2356_v9 }
 0x3e4   : > { %v1333_v34 = vmul.f32 %v2424_v32, %v1312_v24  ;;  %v1331_v45 = vmul.f32 %v2424_v32, %v1310_v22  ;;  %v1334_v6 = vmul.f32 %v2424_v32, %v1313_v2  ;;  %v1332_v56 = vmul.f32 %v2424_v32, %v1311_v35 }
 0x3e5   : > { %v1264_v20 = vmul.f32 %v2382_v12, %v2362_v27  ;;  %v1336_v48 = vmul.f32 %v2424_v32, %v1315_v47  ;;  %v1317_v51 = vmax.f32 %v1301_v41, 0.0  ;;  %v1303_v59 = vadd.f32 %v2400_v23, %v1283_v43 }
 0x3e6   : > { %1351 = vadd.xlane.f32.xlu1 %v1333_v34  ;;  %1347 = vadd.xlane.f32.xlu0 %v1331_v45  ;;  %v1280_v0 = vmul.f32 %v2387_v15, %v1260_v60  ;;  %v1335_v1 = vmul.f32 %v2424_v32, %v1314_v55  ;;  %v1267_v31 = vmul.f32 %v2382_v12, %v2371_v46  ;;  %v2025_v40 = vmov 0  }
 0x3e7   : > { %v1282_v10 = vmul.f32 %v2387_v15, %v1262_v61  ;;  %v1266_v9 = vmul.f32 %v2382_v12, %v2368_v7  ;;  %v1285_v27 = vmul.f32 %v2387_v15, %v1265_v49  ;;  %v1284_v38 = vmul.f32 %v2387_v15, %v1264_v20  ;;  %1933 = vset.pattern.permute.xlu0 %v2025_v40 }
 0x3e8   : > { %v1300_v37 = vadd.f32 %v2400_v23, %v1280_v0  ;;  %v1338_v53 = vmul.f32 %v2424_v32, %v1317_v51  ;;  %v1319_v50 = vmax.f32 %v1303_v59, 0.0  ;;  %v1287_v46 = vmul.f32 %v2387_v15, %v1267_v31  ;;  %1934 = vset.pattern.permute.xlu1 %v2025_v40 }
 0x3e9   : > { %v1302_v54 = vadd.f32 %v2400_v23, %v1282_v10  ;;  %v1269_v57 = vmul.f32 %v2382_v12, %v2377_v52  ;;  %v1286_v7 = vmul.f32 %v2387_v15, %v1266_v9  ;;  %v1268_v63 = vmul.f32 %v2382_v12, %v2374_v44 }
 0x3ea   : > { %1353 = vadd.xlane.f32.xlu1 %v1334_v6  ;;  %1349 = vadd.xlane.f32.xlu0 %v1332_v56  ;;  %v1316_v3 = vmax.f32 %v1300_v37, 0.0  ;;  %v1305_v8 = vadd.f32 %v2400_v23, %v1285_v27  ;;  %v1304_v18 = vadd.f32 %v2400_v23, %v1284_v38  ;;  %v1340_v13 = vmul.f32 %v2424_v32, %v1319_v50 }
 0x3eb   : > { %v1318_v17 = vmax.f32 %v1302_v54, 0.0  ;;  %v1307_v21 = vadd.f32 %v2400_v23, %v1287_v46  ;;  %v1289_v52 = vmul.f32 %v2387_v15, %v1269_v57  ;;  %v1306_v25 = vadd.f32 %v2400_v23, %v1286_v7 }
 0x3ec   : > { %v1337_v11 = vmul.f32 %v2424_v32, %v1316_v3  ;;  %v1321_v58 = vmax.f32 %v1305_v8, 0.0  ;;  %v1320_v12 = vmax.f32 %v1304_v18, 0.0  ;;  %v1288_v4 = vmul.f32 %v2387_v15, %v1268_v63 }
 0x3ed   : > { %v1339_v44 = vmul.f32 %v2424_v32, %v1318_v17  ;;  %v1323_v16 = vmax.f32 %v1307_v21, 0.0  ;;  %v1309_v39 = vadd.f32 %v2400_v23, %v1289_v52  ;;  %v1322_v28 = vmax.f32 %v1306_v25, 0.0 }
 0x3ee   : > { %1357 = vadd.xlane.f32.xlu1 %v1336_v48  ;;  %1355 = vadd.xlane.f32.xlu0 %v1335_v1  ;;  %v1342_v36 = vmul.f32 %v2424_v32, %v1321_v58  ;;  %v1341_v26 = vmul.f32 %v2424_v32, %v1320_v12  ;;  %v1308_v19 = vadd.f32 %v2400_v23, %v1288_v4  ;;  %v2482_v23 = vld [vmem:[%s2561_s4 + $0x7] ss:$0 sm:$0xff] }
 0x3ef   : > { %v1344_v5 = vmul.f32 %v2424_v32, %v1323_v16  ;;  %v1325_v14 = vmax.f32 %v1309_v39, 0.0  ;;  %v1343_v29 = vmul.f32 %v2424_v32, %v1322_v28 }
 0x3f0   : > { %v1324_v15 = vmax.f32 %v1308_v19, 0.0 }
 0x3f1   : > { %v1346_v62 = vmul.f32 %v2424_v32, %v1325_v14 }
 0x3f2   : > { %1361 = vadd.xlane.f32.xlu1 %v1338_v53  ;;  %1359 = vadd.xlane.f32.xlu0 %v1337_v11  ;;  %v1345_v30 = vmul.f32 %v2424_v32, %v1324_v15 }
 0x3f6   : > { %1365 = vadd.xlane.f32.xlu1 %v1340_v13  ;;  %1363 = vadd.xlane.f32.xlu0 %v1339_v44 }
 0x3fa   : > { %1369 = vadd.xlane.f32.xlu1 %v1342_v36  ;;  %1367 = vadd.xlane.f32.xlu0 %v1341_v26 }
 0x3fe   : > { %1373 = vadd.xlane.f32.xlu1 %v1344_v5  ;;  %1371 = vadd.xlane.f32.xlu0 %v1343_v29 }
 0x402   : > { %1377 = vadd.xlane.f32.xlu1 %v1346_v62  ;;  %1375 = vadd.xlane.f32.xlu0 %v1345_v30 }
 0x473   : > { %v1352_v42 = vpop.xlane.xlu1 %1351  ;;  %v1348_v33 = vpop.xlane.xlu0 %1347 }
 0x474   : > { %v1386_v24 = vadd.f32 %v2482_v23, %v1352_v42  ;;  %v1384_v22 = vadd.f32 %v2482_v23, %v1348_v33 }
 0x476   : > { %v1402_v2 = vmax.f32 %v1386_v24, 0.0  ;;  %v1400_v35 = vmax.f32 %v1384_v22, 0.0 }
 0x477   : > { %v1354_v43 = vpop.xlane.xlu1 %1353  ;;  %v1350_v32 = vpop.xlane.xlu0 %1349 }
 0x478   : > { %v1418_v34 = vsub.f32 0.0, %v1402_v2  ;;  %v1416_v45 = vsub.f32 0.0, %v1400_v35  ;;  %v1387_v47 = vadd.f32 %v2482_v23, %v1354_v43  ;;  %v1385_v41 = vadd.f32 %v2482_v23, %v1350_v32 }
 0x47a   : > { %v1436_v6 = vmul.f32 1.442695, %v1418_v34  ;;  %v1432_v55 = vmul.f32 1.442695, %v1416_v45  ;;  %v1403_v56 = vmax.f32 %v1387_v47, 0.0  ;;  %v1401_v49 = vmax.f32 %v1385_v41, 0.0 }
 0x47b   : > { %v1358_v60 = vpop.xlane.xlu1 %1357  ;;  %v1356_v61 = vpop.xlane.xlu0 %1355 }
 0x47c   : > { %1937 = vpow2.f32 %v1436_v6  ;;  %v1419_v20 = vsub.f32 0.0, %v1403_v56  ;;  %v1417_v48 = vsub.f32 0.0, %v1401_v49  ;;  %v1389_v51 = vadd.f32 %v2482_v23, %v1358_v60 }
 0x47d   : > { %1939 = vpow2.f32 %v1432_v55  ;;  %v1388_v59 = vadd.f32 %v2482_v23, %v1356_v61 }
 0x47e   : > { %v1438_v0 = vmul.f32 1.442695, %v1419_v20  ;;  %v1434_v1 = vmul.f32 1.442695, %v1417_v48  ;;  %v1405_v31 = vmax.f32 %v1389_v51, 0.0 }
 0x47f   : > { %v1362_v10 = vpop.xlane.xlu1 %1361  ;;  %v1404_v9 = vmax.f32 %v1388_v59, 0.0  ;;  %v1360_v27 = vpop.xlane.xlu0 %1359 }
 0x480   : > { %v1390_v37 = vadd.f32 %v2482_v23, %v1360_v27  ;;  %1941 = vpow2.f32 %v1434_v1  ;;  %v1391_v38 = vadd.f32 %v2482_v23, %v1362_v10  ;;  %v1421_v53 = vsub.f32 0.0, %v1405_v31 }
 0x481   : > { %v1420_v54 = vsub.f32 0.0, %v1404_v9  ;;  %1943 = vpow2.f32 %v1438_v0 }
 0x482   : > { %v1406_v46 = vmax.f32 %v1390_v37, 0.0  ;;  %v1407_v63 = vmax.f32 %v1391_v38, 0.0  ;;  %v1442_v13 = vmul.f32 1.442695, %v1421_v53 }
 0x483   : > { %v1366_v50 = vpop.xlane.xlu1 %1365  ;;  %v1440_v3 = vmul.f32 1.442695, %v1420_v54  ;;  %v1364_v57 = vpop.xlane.xlu0 %1363 }
 0x484   : > { %v1393_v7 = vadd.f32 %v2482_v23, %v1366_v50  ;;  %v1392_v17 = vadd.f32 %v2482_v23, %v1364_v57  ;;  %v1422_v52 = vsub.f32 0.0, %v1406_v46  ;;  %v1423_v16 = vsub.f32 0.0, %v1407_v63 }
 0x485   : > { %1945 = vpow2.f32 %v1440_v3 }
 0x486   : > { %v1938_v8 = vpop.eup %1937  ;;  %v1409_v11 = vmax.f32 %v1393_v7, 0.0  ;;  %v1408_v26 = vmax.f32 %v1392_v17, 0.0  ;;  %v1444_v5 = vmul.f32 1.442695, %v1422_v52  ;;  %v1446_v42 = vmul.f32 1.442695, %v1423_v16 }
 0x487   : > { %v1940_v18 = vpop.eup %1939  ;;  %v1370_v21 = vpop.xlane.xlu1 %1369  ;;  %v1466_v4 = vadd.f32 1.0, %v1938_v8 }
 0x488   : > { %v1368_v25 = vpop.xlane.xlu0 %1367  ;;  %v1464_v58 = vadd.f32 1.0, %v1940_v18  ;;  %v1425_v44 = vsub.f32 0.0, %v1409_v11  ;;  %v1395_v12 = vadd.f32 %v2482_v23, %v1370_v21  ;;  %v1424_v22 = vsub.f32 0.0, %v1408_v26 }
 0x489   : > { %v1394_v14 = vadd.f32 %v2482_v23, %v1368_v25 }
 0x48a   : > { %1947 = vrcp.f32 %v1464_v58  ;;  %v1450_v39 = vmul.f32 1.442695, %v1425_v44  ;;  %v1411_v36 = vmax.f32 %v1395_v12, 0.0  ;;  %v1942_v28 = vpop.eup %1941  ;;  %v1448_v56 = vmul.f32 1.442695, %v1424_v22 }
 0x48b   : > { %1949 = vpow2.f32 %v1442_v13  ;;  %v1374_v19 = vpop.xlane.xlu1 %1373  ;;  %v1944_v15 = vpop.eup %1943  ;;  %v1465_v62 = vadd.f32 1.0, %v1942_v28  ;;  %v1410_v43 = vmax.f32 %v1394_v14, 0.0 }
 0x48c   : > { %v1372_v29 = vpop.xlane.xlu0 %1371  ;;  %1951 = vpow2.f32 %v1450_v39  ;;  %v1427_v30 = vsub.f32 0.0, %v1411_v36  ;;  %v1397_v40 = vadd.f32 %v2482_v23, %v1374_v19  ;;  %v1467_v2 = vadd.f32 1.0, %v1944_v15 }
 0x48d   : > { %1953 = vrcp.f32 %v1466_v4  ;;  %v1396_v32 = vadd.f32 %v2482_v23, %v1372_v29  ;;  %v1426_v49 = vsub.f32 0.0, %v1410_v43 }
 0x48e   : > { %1955 = vrcp.f32 %v1465_v62  ;;  %v1454_v33 = vmul.f32 1.442695, %v1427_v30  ;;  %v1413_v24 = vmax.f32 %v1397_v40, 0.0 }
 0x48f   : > { %1957 = vpow2.f32 %v1444_v5  ;;  %v1378_v35 = vpop.xlane.xlu1 %1377  ;;  %v1946_v41 = vpop.eup %1945  ;;  %v1412_v60 = vmax.f32 %v1396_v32, 0.0  ;;  %v1452_v9 = vmul.f32 1.442695, %v1426_v49 }
 0x490   : > { %1959 = vpow2.f32 %v1454_v33  ;;  %v1429_v34 = vsub.f32 0.0, %v1413_v24  ;;  %v1399_v45 = vadd.f32 %v2482_v23, %v1378_v35  ;;  %v1376_v47 = vpop.xlane.xlu0 %1375  ;;  %v1468_v48 = vadd.f32 1.0, %v1946_v41 }
 0x491   : > { %1961 = vpow2.f32 %v1446_v42  ;;  %v1398_v61 = vadd.f32 %v2482_v23, %v1376_v47  ;;  %v1428_v27 = vsub.f32 0.0, %v1412_v60 }
 0x492   : > { %v1458_v6 = vmul.f32 1.442695, %v1429_v34  ;;  %v1415_v55 = vmax.f32 %v1399_v45, 0.0  ;;  %1963 = vrcp.f32 %v1467_v2 }
 0x493   : > { %v1414_v37 = vmax.f32 %v1398_v61, 0.0  ;;  %v1456_v3 = vmul.f32 1.442695, %v1428_v27 }
 0x494   : > { %v1948_v20 = vpop.eup %1947  ;;  %1965 = vpow2.f32 %v1458_v6  ;;  %v1431_v51 = vsub.f32 0.0, %v1415_v55 }
 0x495   : > { %v1950_v59 = vpop.eup %1949  ;;  %1498 = vperm.xlu0 %1933, %v1948_v20   ;;  %1967 = vpow2.f32 %v1448_v56  ;;  %v1430_v46 = vsub.f32 0.0, %v1414_v37 }
 0x496   : > { %v1952_v0 = vpop.eup %1951  ;;  %v1462_v1 = vmul.f32 1.442695, %v1431_v51  ;;  %v1469_v54 = vadd.f32 1.0, %v1950_v59  ;;  %1969 = vrcp.f32 %v1468_v48 }
 0x497   : > { %v1954_v31 = vpop.eup %1953  ;;  %v1473_v10 = vadd.f32 1.0, %v1952_v0  ;;  %v1460_v17 = vmul.f32 1.442695, %v1430_v46 }
 0x498   : > { %v1956_v38 = vpop.eup %1955 }
 0x499   : > { %v1958_v53 = vpop.eup %1957  ;;  %1971 = vrcp.f32 %v1473_v10  ;;  %1503 = vperm.xlu1 %1934, %v1956_v38  }
 0x49a   : > { %v1960_v23 = vpop.eup %1959  ;;  %1973 = vpow2.f32 %v1462_v1  ;;  %v1470_v7 = vadd.f32 1.0, %v1958_v53 }
 0x49b   : > { %v1475_v50 = vadd.f32 1.0, %v1960_v23  ;;  %1975 = vpow2.f32 %v1452_v9  ;;  %v1962_v57 = vpop.eup %1961 }
 0x49c   : > { %1977 = vrcp.f32 %v1469_v54  ;;  %v1964_v63 = vpop.eup %1963  ;;  %v1471_v13 = vadd.f32 1.0, %v1962_v57 }
 0x49d   : > { %1979 = vrcp.f32 %v1475_v50  ;;  %1508 = vperm.xlu1 %1934, %v1954_v31  }
 0x49e   : > { %v1966_v8 = vpop.eup %1965  ;;  %1981 = vpow2.f32 %v1456_v3 }
 0x49f   : > { %v1477_v11 = vadd.f32 1.0, %v1966_v8  ;;  %v1968_v18 = vpop.eup %1967  ;;  %1983 = vrcp.f32 %v1470_v7 }
 0x4a0   : > { %v1970_v21 = vpop.eup %1969  ;;  %v1472_v58 = vadd.f32 1.0, %v1968_v18 }
 0x4a1   : > { %1985 = vrcp.f32 %v1477_v11  ;;  %1513 = vperm.xlu1 %1934, %v1964_v63  }
 0x4a2   : > { %1987 = vpow2.f32 %v1460_v17 }
 0x4a3   : > { %v1972_v52 = vpop.eup %1971  ;;  %1989 = vrcp.f32 %v1471_v13 }
 0x4a4   : > { %v1974_v25 = vpop.eup %1973  ;;  %1543 = vperm.xlu0 %1933, %v1972_v52  }
 0x4a5   : > { %v1976_v44 = vpop.eup %1975  ;;  %v1479_v12 = vadd.f32 1.0, %v1974_v25  ;;  %1518 = vperm.xlu1 %1934, %v1970_v21  }
 0x4a6   : > { %v1978_v4 = vpop.eup %1977  ;;  %v1474_v39 = vadd.f32 1.0, %v1976_v44 }
 0x4a7   : > { %v1980_v16 = vpop.eup %1979  ;;  %1991 = vrcp.f32 %v1479_v12 }
 0x4a8   : > { %1993 = vrcp.f32 %v1472_v58  ;;  %1553 = vperm.xlu0 %1933, %v1980_v16   ;;  %v1982_v36 = vpop.eup %1981 }
 0x4a9   : > { %1523 = vperm.xlu1 %1934, %v1978_v4   ;;  %v1984_v26 = vpop.eup %1983  ;;  %1995 = vrcp.f32 %v1474_v39  ;;  %v1476_v19 = vadd.f32 1.0, %v1982_v36 }
 0x4ab   : > { %v1986_v28 = vpop.eup %1985  ;;  %1997 = vrcp.f32 %v1476_v19 }
 0x4ac   : > { %1563 = vperm.xlu0 %1933, %v1986_v28   ;;  %v1988_v5 = vpop.eup %1987 }
 0x4ad   : > { %1528 = vperm.xlu1 %1934, %v1984_v26   ;;  %v1990_v14 = vpop.eup %1989  ;;  %v1478_v29 = vadd.f32 1.0, %v1988_v5 }
 0x4af   : > { %1999 = vrcp.f32 %v1478_v29 }
 0x4b1   : > { %v1992_v15 = vpop.eup %1991  ;;  %1533 = vperm.xlu1 %1934, %v1990_v14  }
 0x4b2   : > { %v1994_v62 = vpop.eup %1993  ;;  %1573 = vperm.xlu0 %1933, %v1992_v15  }
 0x4b3   : > { %v1996_v30 = vpop.eup %1995 }
 0x4b5   : > { %1538 = vperm.xlu1 %1934, %v1994_v62   ;;  %v1998_v40 = vpop.eup %1997 }
 0x4b9   : > { %1548 = vperm.xlu1 %1934, %v1996_v30   ;;  %v2000_v42 = vpop.eup %1999 }
 0x4bd   : > { %1558 = vperm.xlu1 %1934, %v1998_v40  }
 0x4c1   : > { %1568 = vperm.xlu1 %1934, %v2000_v42  }
 0x514   : > { %v1499_v33 = vpop.permute.xlu0 %1498 }
 0x515   : > { %1576 = vst [vmem:[%s2562_s5] sm:$0xff] %v1499_v33 }
 0x518   : > { %v1504_v24 = vpop.permute.xlu1 %1503 }
 0x519   : > { %1577 = vst [vmem:[%s2562_s5 + $0x8] sm:$0xff] %v1504_v24 }
 0x51c   : > { %v1509_v22 = vpop.permute.xlu1 %1508 }
 0x51d   : > { %1578 = vst [vmem:[%s2562_s5 + $0x10] sm:$0xff] %v1509_v22 }
 0x520   : > { %v1514_v2 = vpop.permute.xlu1 %1513 }
 0x521   : > { %1579 = vst [vmem:[%s2562_s5 + $0x18] sm:$0xff] %v1514_v2 }
 0x523   : > { %v1544_v35 = vpop.permute.xlu0 %1543 }
 0x524   : > { %v1519_v43 = vpop.permute.xlu1 %1518  ;;  %1585 = vst [vmem:[%s2562_s5 + $0x48] sm:$0xff] %v1544_v35 }
 0x525   : > { %1580 = vst [vmem:[%s2562_s5 + $0x20] sm:$0xff] %v1519_v43 }
 0x527   : > { %v1554_v32 = vpop.permute.xlu0 %1553 }
 0x528   : > { %v1524_v34 = vpop.permute.xlu1 %1523  ;;  %1587 = vst [vmem:[%s2562_s5 + $0x58] sm:$0xff] %v1554_v32 }
 0x529   : > { %1581 = vst [vmem:[%s2562_s5 + $0x28] sm:$0xff] %v1524_v34 }
 0x52b   : > { %v1564_v45 = vpop.permute.xlu0 %1563 }
 0x52c   : > { %v1529_v47 = vpop.permute.xlu1 %1528  ;;  %1589 = vst [vmem:[%s2562_s5 + $0x68] sm:$0xff] %v1564_v45 }
 0x52d   : > { %1582 = vst [vmem:[%s2562_s5 + $0x30] sm:$0xff] %v1529_v47 }
 0x530   : > { %v1534_v41 = vpop.permute.xlu1 %1533 }
 0x531   : > { %1583 = vst [vmem:[%s2562_s5 + $0x38] sm:$0xff] %v1534_v41  ;;  %v1574_v6 = vpop.permute.xlu0 %1573 }
 0x532   : > { %1591 = vst [vmem:[%s2562_s5 + $0x78] sm:$0xff] %v1574_v6 }
 0x534   : > { %v1539_v55 = vpop.permute.xlu1 %1538 }
 0x535   : > { %1584 = vst [vmem:[%s2562_s5 + $0x40] sm:$0xff] %v1539_v55 }
 0x538   : > { %v1549_v56 = vpop.permute.xlu1 %1548 }
 0x539   : > { %1586 = vst [vmem:[%s2562_s5 + $0x50] sm:$0xff] %v1549_v56 }
 0x53c   : > { %v1559_v49 = vpop.permute.xlu1 %1558 }
 0x53d   : > { %1588 = vst [vmem:[%s2562_s5 + $0x60] sm:$0xff] %v1559_v49 }
 0x540   : > { %v1569_v60 = vpop.permute.xlu1 %1568 }
 0x541   : > { %1590 = vst [vmem:[%s2562_s5 + $0x70] sm:$0xff] %v1569_v60 }
 0x542 PF: > { %s15_s20 = sadd.s32 1, %s2023_s20   ;;  %s2563_s18 = smov %s2019_s19 }
 0x543   : > { %p12_p6 = scmp.ge.s32.totalorder %s15_s20, 4   ;;  %s2564_s19 = smov %s2566_s21 }
 0x545   :  { %14 = sbr.rel (!%p12_p6) target bundleno = 2 (0x2), region = 79 }

</bundles_post_ra>
